<compile_context>
chip_gen: v6e
topology: v6e:2x2x1
jax: 0.10.0
libtpu: 0.0.40
codegen_flags: <defaults>
</compile_context>

<pallas_src>
import functools

import jax
import jax.numpy as jnp
from jax import lax
from jax.experimental import pallas as pl
from jax.experimental.pallas import tpu as pltpu

# ----- static module configuration (mirrors __init__ args) -------------------
ELEC_SIDE = 16                  # elec_side_dim  -> 256 electrode units
NEU_SIDE = 16                   # neu_side_dim   -> 256 neuron units
IN_DIM = 1024
SIG_SHIFT = 0.5                 # shift
SIG_MAG = 4.0                   # magnitude
NOISE = 0.05                    # noise level on LNL weights
DROP_RATE = 0.3                 # unused in eval-mode forward (dropout == identity)
AF_ARRAY = ("sig", "ReLU", "linear")   # chosen activation configuration
# TODO(synk): '2sig' (DoubleSigmoid) is referenced in the source but its class is not
# defined there; only 'sig' / 'ReLU' / 'linear' are implemented here.


def _apply_af(name, x):
    """Activation dictionary from AutoEncoder_fc.__init__ (static dispatch, f32)."""
    if name == "sig":
        return jax.nn.sigmoid(SIG_MAG * (x - SIG_SHIFT))
    if name == "ReLU":
        return jnp.maximum(x, 0.0)
    if name == "linear":
        return x
    raise ValueError(f"unsupported activation: {name}")


def _round_up(x, m):
    return ((x + m - 1) // m) * m


# ----- fused kernel (one batch tile per grid step) ----------------------------
def autoencoder_fc_kernel(x_ref, w1t_ref, b1_ref, wefft_ref, w3t_ref, b3_ref,
                          addnoise_ref, out_ref, lyr1_ref, lyr2_ref):
    wdt = w1t_ref.dtype
    x = x_ref[...].astype(wdt)

    # layer1 (Linear 1024 -> E^2, bias) + af[0]; MXU accumulates in f32
    h1 = jnp.dot(x, w1t_ref[...], preferred_element_type=jnp.float32)
    h1 = _apply_af(AF_ARRAY[0], h1 + b1_ref[...])
    lyr1_ref[...] = h1.astype(lyr1_ref.dtype)

    # LNL model with eval-mode noise already folded into the weight, no bias
    h2 = jnp.dot(h1.astype(wdt), wefft_ref[...], preferred_element_type=jnp.float32)
    h2 = _apply_af(AF_ARRAY[1], h2)

    # x = x + 0.25 * rand_like(x)  (uniform [0,1) noise supplied by caller)
    # TODO(synk): could be generated in-kernel via pltpu.prng_random_bits; kept as an
    # input so the host controls the RNG stream (bit-exact parity with the reference).
    h2 = h2 + 0.25 * addnoise_ref[...]
    lyr2_ref[...] = h2.astype(lyr2_ref.dtype)

    # dropout: eval mode -> identity (no-op)

    # layer3 (Linear N^2 -> 1024, bias) + af[2]
    y = jnp.dot(h2.astype(wdt), w3t_ref[...], preferred_element_type=jnp.float32)
    out_ref[...] = _apply_af(AF_ARRAY[2], y + b3_ref[...]).astype(out_ref.dtype)


# ----- one-time parameter layout prep (NOT per-call) ---------------------------
def prepare_params(w1, b1, w_lnl, noise_model2, w3, b3, weight_dtype=jnp.float32):
    """Transpose weights to (in, out), fold eval-mode LNL noise, cast matrices.

    Call once at parameter-load time; the result is passed to every forward call.
    Biases stay f32 (bias add + activations are done in f32 in the kernel).
    """
    w1t = jnp.asarray(w1, jnp.float32).T.astype(weight_dtype)                    # (1024, E^2)
    wefft = (jnp.asarray(w_lnl, jnp.float32)
             + jnp.asarray(noise_model2, jnp.float32)).T.astype(weight_dtype)    # (E^2, N^2)
    w3t = jnp.asarray(w3, jnp.float32).T.astype(weight_dtype)                    # (N^2, 1024)
    b1r = jnp.asarray(b1, jnp.float32).reshape(1, -1)
    b3r = jnp.asarray(b3, jnp.float32).reshape(1, -1)
    return (w1t, b1r, wefft, w3t, b3r)


# ----- forward wrapper ----------------------------------------------------------
@functools.partial(jax.jit, static_argnames=("block_b",))
def autoencoder_fc(x, params, add_noise, *, block_b=256):
    """x: (B, 1024) f32. params from prepare_params. Returns (out, lyr1, lyr2)."""
    w1t, b1r, wefft, w3t, b3r = params
    B, in_dim = x.shape
    e2 = w1t.shape[1]
    n2 = wefft.shape[1]

    # batch tile: multiple of 8 sublanes, capped at block_b; pad B if needed
    tb = block_b if B >= block_b else max(8, _round_up(B, 8))
    b_pad = _round_up(B, tb)
    if b_pad != B:
        x = jnp.pad(x, ((0, b_pad - B), (0, 0)))
        add_noise = jnp.pad(add_noise, ((0, b_pad - B), (0, 0)))

    grid = (b_pad // tb,)

    def batch_spec(cols):
        return pl.BlockSpec((tb, cols), lambda i: (i, 0))

    def const_spec(shape):
        return pl.BlockSpec(shape, lambda i: (0, 0))   # resident: same block every step

    out_shapes = (
        jax.ShapeDtypeStruct((b_pad, in_dim), jnp.float32),   # out
        jax.ShapeDtypeStruct((b_pad, e2), jnp.float32),       # lyr1
        jax.ShapeDtypeStruct((b_pad, n2), jnp.float32),       # lyr2
    )

    out, lyr1, lyr2 = pl.pallas_call(
        autoencoder_fc_kernel,
        out_shape=out_shapes,
        grid_spec=pltpu.PrefetchScalarGridSpec(
            num_scalar_prefetch=0,
            grid=grid,
            in_specs=[
                batch_spec(in_dim),          # x            (tiled over batch)
                const_spec(w1t.shape),       # W1^T         (resident)
                const_spec(b1r.shape),       # b1           (resident)
                const_spec(wefft.shape),     # (W_LNL+n2)^T (resident)
                const_spec(w3t.shape),       # W3^T         (resident)
                const_spec(b3r.shape),       # b3           (resident)
                batch_spec(n2),              # add_noise    (tiled over batch)
            ],
            out_specs=(
                batch_spec(in_dim),          # out
                batch_spec(e2),              # lyr1
                batch_spec(n2),              # lyr2
            ),
        ),
        compiler_params=pltpu.CompilerParams(
            dimension_semantics=("parallel",),
        ),
    )(x, w1t, b1r, wefft, w3t, b3r, add_noise)

    if b_pad != B:
        out, lyr1, lyr2 = out[:B], lyr1[:B], lyr2[:B]
    return out, lyr1, lyr2


# ----- pure-JAX reference for a sanity check ------------------------------------
def reference(x, w1, b1, w_lnl, noise_model2, w3, b3, add_noise):
    hp = lax.Precision.HIGHEST
    h1 = _apply_af(AF_ARRAY[0], jnp.dot(x, w1.T, precision=hp) + b1)
    h2 = _apply_af(AF_ARRAY[1], jnp.dot(h1, (w_lnl + noise_model2).T, precision=hp))
    h2 = h2 + 0.25 * add_noise
    y = _apply_af(AF_ARRAY[2], jnp.dot(h2, w3.T, precision=hp) + b3)
    return y, h1, h2


if __name__ == "__main__":
    B = 8
    E2 = ELEC_SIDE ** 2
    N2 = NEU_SIDE ** 2

    key = jax.random.PRNGKey(0)
    kx, k1, kb1, kl, kn, k3, kb3, kadd = jax.random.split(key, 8)

    x = jax.random.normal(kx, (B, IN_DIM), dtype=jnp.float32)

    # deterministic synthetic parameters (PyTorch shapes: (out_features, in_features))
    w1 = jax.random.normal(k1, (E2, IN_DIM), dtype=jnp.float32) * 0.02
    b1 = jax.random.normal(kb1, (E2,), dtype=jnp.float32) * 0.02
    w_lnl = jax.random.normal(kl, (N2, E2), dtype=jnp.float32) * 0.02
    # noise_model2 = noise * U(-1, 1) of LNL weight shape (fixed in eval)
    noise_model2 = NOISE * (2.0 * jax.random.uniform(kn, (N2, E2), dtype=jnp.float32) - 1.0)
    w3 = jax.random.normal(k3, (IN_DIM, N2), dtype=jnp.float32) * 0.02
    b3 = jax.random.normal(kb3, (IN_DIM,), dtype=jnp.float32) * 0.02
    # torch.rand_like(x) equivalent: uniform [0, 1)
    add_noise = jax.random.uniform(kadd, (B, N2), dtype=jnp.float32)

    ref_out, ref_l1, ref_l2 = reference(x, w1, b1, w_lnl, noise_model2, w3, b3, add_noise)

    # --- f32 weights (exact path) ------------------------------------------------
    params_f32 = prepare_params(w1, b1, w_lnl, noise_model2, w3, b3,
                                weight_dtype=jnp.float32)
    out, lyr1, lyr2 = autoencoder_fc(x, params_f32, add_noise)
    jax.block_until_ready((out, lyr1, lyr2))

    assert out.shape == (B, IN_DIM) and lyr1.shape == (B, E2) and lyr2.shape == (B, N2)
    assert jnp.allclose(out, ref_out, atol=2e-3, rtol=2e-3), "out mismatch"
    assert jnp.allclose(lyr1, ref_l1, atol=1e-3, rtol=1e-3), "lyr1 mismatch"
    assert jnp.allclose(lyr2, ref_l2, atol=1e-3, rtol=1e-3), "lyr2 mismatch"

    # --- bf16 weights (halved weight DMA / residency on v6e/v7x), loose tolerance --
    params_bf16 = prepare_params(w1, b1, w_lnl, noise_model2, w3, b3,
                                 weight_dtype=jnp.bfloat16)
    out_b, lyr1_b, lyr2_b = autoencoder_fc(x, params_bf16, add_noise)
    jax.block_until_ready((out_b, lyr1_b, lyr2_b))
    assert jnp.all(jnp.isfinite(out_b))
    assert jnp.allclose(out_b, ref_out, atol=5e-2, rtol=1e-1), "bf16 out mismatch"

    print("KERNEL_OK")
</pallas_src>

<mosaic_0001>
module attributes {stable_mosaic.version = 11 : i64} {
  func.func @autoencoder_fc_kernel(%arg0: i32, %arg1: memref<8x1024xf32, #tpu.memory_space<vmem>>, %arg2: memref<1024x256xf32, #tpu.memory_space<vmem>>, %arg3: memref<1x256xf32, #tpu.memory_space<vmem>>, %arg4: memref<256x256xf32, #tpu.memory_space<vmem>>, %arg5: memref<256x1024xf32, #tpu.memory_space<vmem>>, %arg6: memref<1x1024xf32, #tpu.memory_space<vmem>>, %arg7: memref<8x256xf32, #tpu.memory_space<vmem>>, %arg8: memref<8x1024xf32, #tpu.memory_space<vmem>>, %arg9: memref<8x256xf32, #tpu.memory_space<vmem>>, %arg10: memref<8x256xf32, #tpu.memory_space<vmem>>) attributes {dimension_semantics = [#tpu.dimension_semantics<parallel>], iteration_bounds = array<i64: 1>, scalar_prefetch = 0 : i64, scratch_operands = 0 : i64, tpu.core_type = #tpu.core_type<tc>, window_params = [{transform_indices = @transform_0, window_bounds = array<i64: 8, 1024>}, {pipeline_mode = #tpu.pipeline_mode<synchronous>, transform_indices = @transform_1, window_bounds = array<i64: 1024, 256>}, {pipeline_mode = #tpu.pipeline_mode<synchronous>, transform_indices = @transform_2, window_bounds = array<i64: 1, 256>}, {pipeline_mode = #tpu.pipeline_mode<synchronous>, transform_indices = @transform_3, window_bounds = array<i64: 256, 256>}, {pipeline_mode = #tpu.pipeline_mode<synchronous>, transform_indices = @transform_4, window_bounds = array<i64: 256, 1024>}, {pipeline_mode = #tpu.pipeline_mode<synchronous>, transform_indices = @transform_5, window_bounds = array<i64: 1, 1024>}, {transform_indices = @transform_6, window_bounds = array<i64: 8, 256>}, {transform_indices = @transform_7, window_bounds = array<i64: 8, 1024>}, {transform_indices = @transform_8, window_bounds = array<i64: 8, 256>}, {transform_indices = @transform_9, window_bounds = array<i64: 8, 256>}]} {
    %c0 = arith.constant 0 : index
    %c0_0 = arith.constant 0 : index
    %0 = vector.load %arg1[%c0, %c0_0] : memref<8x1024xf32, #tpu.memory_space<vmem>>, vector<8x1024xf32>
    %c0_1 = arith.constant 0 : index
    %c0_2 = arith.constant 0 : index
    %1 = vector.load %arg2[%c0_1, %c0_2] : memref<1024x256xf32, #tpu.memory_space<vmem>>, vector<1024x256xf32>
    %cst = arith.constant dense<0.000000e+00> : vector<8x256xf32>
    %2 = tpu.matmul %0, %1, %cst {dimension_numbers = #tpu.dot_dimension_numbers<[1], [0], [0], [1], [0, 0, 1, 1], [], []>} : vector<8x1024xf32>, vector<1024x256xf32>, vector<8x256xf32> -> vector<8x256xf32>
    %c0_3 = arith.constant 0 : index
    %c0_4 = arith.constant 0 : index
    %3 = vector.load %arg3[%c0_3, %c0_4] : memref<1x256xf32, #tpu.memory_space<vmem>>, vector<1x256xf32>
    %4 = vector.broadcast %3 : vector<1x256xf32> to vector<8x256xf32>
    %5 = arith.addf %2, %4 : vector<8x256xf32>
    %cst_5 = arith.constant 5.000000e-01 : f32
    %6 = vector.broadcast %cst_5 : f32 to vector<8x256xf32>
    %7 = arith.subf %5, %6 : vector<8x256xf32>
    %cst_6 = arith.constant 4.000000e+00 : f32
    %8 = vector.broadcast %cst_6 : f32 to vector<8x256xf32>
    %9 = arith.mulf %8, %7 : vector<8x256xf32>
    %10 = arith.negf %9 : vector<8x256xf32>
    %11 = math.exp %10 : vector<8x256xf32>
    %cst_7 = arith.constant 1.000000e+00 : f32
    %12 = vector.broadcast %cst_7 : f32 to vector<8x256xf32>
    %13 = arith.addf %12, %11 : vector<8x256xf32>
    %14 = arith.divf %12, %13 : vector<8x256xf32>
    %c0_8 = arith.constant 0 : index
    %c0_9 = arith.constant 0 : index
    %15 = vector.load %arg9[%c0_8, %c0_9] : memref<8x256xf32, #tpu.memory_space<vmem>>, vector<8x256xf32>
    tpu.vector_store %arg9[%c0_8, %c0_9], %14 {strides = array<i32>} : memref<8x256xf32, #tpu.memory_space<vmem>>, vector<8x256xf32>,
    %c0_10 = arith.constant 0 : index
    %c0_11 = arith.constant 0 : index
    %16 = vector.load %arg4[%c0_10, %c0_11] : memref<256x256xf32, #tpu.memory_space<vmem>>, vector<256x256xf32>
    %cst_12 = arith.constant dense<0.000000e+00> : vector<8x256xf32>
    %17 = tpu.matmul %14, %16, %cst_12 {dimension_numbers = #tpu.dot_dimension_numbers<[1], [0], [0], [1], [0, 0, 1, 1], [], []>} : vector<8x256xf32>, vector<256x256xf32>, vector<8x256xf32> -> vector<8x256xf32>
    %cst_13 = arith.constant 0.000000e+00 : f32
    %18 = vector.broadcast %cst_13 : f32 to vector<8x256xf32>
    %19 = arith.maximumf %17, %18 : vector<8x256xf32>
    %c0_14 = arith.constant 0 : index
    %c0_15 = arith.constant 0 : index
    %20 = vector.load %arg7[%c0_14, %c0_15] : memref<8x256xf32, #tpu.memory_space<vmem>>, vector<8x256xf32>
    %cst_16 = arith.constant 2.500000e-01 : f32
    %21 = vector.broadcast %cst_16 : f32 to vector<8x256xf32>
    %22 = arith.mulf %21, %20 : vector<8x256xf32>
    %23 = arith.addf %19, %22 : vector<8x256xf32>
    %c0_17 = arith.constant 0 : index
    %c0_18 = arith.constant 0 : index
    %24 = vector.load %arg10[%c0_17, %c0_18] : memref<8x256xf32, #tpu.memory_space<vmem>>, vector<8x256xf32>
    tpu.vector_store %arg10[%c0_17, %c0_18], %23 {strides = array<i32>} : memref<8x256xf32, #tpu.memory_space<vmem>>, vector<8x256xf32>,
    %c0_19 = arith.constant 0 : index
    %c0_20 = arith.constant 0 : index
    %25 = vector.load %arg5[%c0_19, %c0_20] : memref<256x1024xf32, #tpu.memory_space<vmem>>, vector<256x1024xf32>
    %cst_21 = arith.constant dense<0.000000e+00> : vector<8x1024xf32>
    %26 = tpu.matmul %23, %25, %cst_21 {dimension_numbers = #tpu.dot_dimension_numbers<[1], [0], [0], [1], [0, 0, 1, 1], [], []>} : vector<8x256xf32>, vector<256x1024xf32>, vector<8x1024xf32> -> vector<8x1024xf32>
    %c0_22 = arith.constant 0 : index
    %c0_23 = arith.constant 0 : index
    %27 = vector.load %arg6[%c0_22, %c0_23] : memref<1x1024xf32, #tpu.memory_space<vmem>>, vector<1x1024xf32>
    %28 = vector.broadcast %27 : vector<1x1024xf32> to vector<8x1024xf32>
    %29 = arith.addf %26, %28 : vector<8x1024xf32>
    %c0_24 = arith.constant 0 : index
    %c0_25 = arith.constant 0 : index
    %30 = vector.load %arg8[%c0_24, %c0_25] : memref<8x1024xf32, #tpu.memory_space<vmem>>, vector<8x1024xf32>
    tpu.vector_store %arg8[%c0_24, %c0_25], %29 {strides = array<i32>} : memref<8x1024xf32, #tpu.memory_space<vmem>>, vector<8x1024xf32>,
    return
  }
  func.func @transform_0(%arg0: i32) -> (i32, i32) {
    %c0_i32 = arith.constant 0 : i32
    %c0_i32_0 = arith.constant 0 : i32
    return %arg0, %c0_i32 : i32, i32
  }
  func.func @transform_1(%arg0: i32) -> (i32, i32) {
    %c0_i32 = arith.constant 0 : i32
    %c0_i32_0 = arith.constant 0 : i32
    %c0_i32_1 = arith.constant 0 : i32
    return %c0_i32, %c0_i32_0 : i32, i32
  }
  func.func @transform_2(%arg0: i32) -> (i32, i32) {
    %c0_i32 = arith.constant 0 : i32
    %c0_i32_0 = arith.constant 0 : i32
    %c0_i32_1 = arith.constant 0 : i32
    return %c0_i32, %c0_i32_0 : i32, i32
  }
  func.func @transform_3(%arg0: i32) -> (i32, i32) {
    %c0_i32 = arith.constant 0 : i32
    %c0_i32_0 = arith.constant 0 : i32
    %c0_i32_1 = arith.constant 0 : i32
    return %c0_i32, %c0_i32_0 : i32, i32
  }
  func.func @transform_4(%arg0: i32) -> (i32, i32) {
    %c0_i32 = arith.constant 0 : i32
    %c0_i32_0 = arith.constant 0 : i32
    %c0_i32_1 = arith.constant 0 : i32
    return %c0_i32, %c0_i32_0 : i32, i32
  }
  func.func @transform_5(%arg0: i32) -> (i32, i32) {
    %c0_i32 = arith.constant 0 : i32
    %c0_i32_0 = arith.constant 0 : i32
    %c0_i32_1 = arith.constant 0 : i32
    return %c0_i32, %c0_i32_0 : i32, i32
  }
  func.func @transform_6(%arg0: i32) -> (i32, i32) {
    %c0_i32 = arith.constant 0 : i32
    %c0_i32_0 = arith.constant 0 : i32
    return %arg0, %c0_i32 : i32, i32
  }
  func.func @transform_7(%arg0: i32) -> (i32, i32) {
    %c0_i32 = arith.constant 0 : i32
    %c0_i32_0 = arith.constant 0 : i32
    return %arg0, %c0_i32 : i32, i32
  }
  func.func @transform_8(%arg0: i32) -> (i32, i32) {
    %c0_i32 = arith.constant 0 : i32
    %c0_i32_0 = arith.constant 0 : i32
    return %arg0, %c0_i32 : i32, i32
  }
  func.func @transform_9(%arg0: i32) -> (i32, i32) {
    %c0_i32 = arith.constant 0 : i32
    %c0_i32_0 = arith.constant 0 : i32
    return %arg0, %c0_i32 : i32, i32
  }
}

</mosaic_0001>

<bundles_post_ra>
// kernel: autoencoder_fc.1
= control target key start
LH: loop header
LB: loop body
LE: loop exit
PB: predicated region body
PF: predicated region fallthrough
CT: control target
= control target key end

     0   :  { %15 = vsyncpa [#allocation3], 0  ;;  %s1800_s0 = inlined_call_operand.hbm [shape: f32[8,1024], index: 0, kind: input, shape index: {}]   ;;  %s1801_s1 = inlined_call_operand.hbm [shape: f32[1024,256], index: 1, kind: input, shape index: {}]   ;;  %s1802_s2 = inlined_call_operand.hbm [shape: f32[1,256], index: 2, kind: input, shape index: {}]   ;;  %s1803_s3 = inlined_call_operand.hbm [shape: f32[256,256], index: 3, kind: input, shape index: {}]   ;;  %s1804_s4 = inlined_call_operand.hbm [shape: f32[256,1024], index: 4, kind: input, shape index: {}]   ;;  %s1805_s5 = inlined_call_operand.vmem [shape: f32[1,1024], index: 5, kind: input, shape index: {}]   ;;  %s1806_s6 = inlined_call_operand.hbm [shape: f32[8,256], index: 6, kind: input, shape index: {}]   ;;  %s1807_s7 = inlined_call_operand.hbm [shape: f32[8,1024], index: 7, kind: output, shape index: {0}]   ;;  %s1808_s8 = inlined_call_operand.hbm [shape: f32[8,256], index: 8, kind: output, shape index: {1}]   ;;  %s1809_s9 = inlined_call_operand.hbm [shape: f32[8,256], index: 9, kind: output, shape index: {2}]  }
   0x1   :  { %16 = vsyncpa [#allocation6], 0 }
   0x2   :  { %17 = vsyncpa [#allocation9], 0 }
   0x3   :  { %18 = vsyncpa [#allocation12], 0 }
   0x4   :  { %19 = vsyncpa [#allocation4], 0 }
   0x5   :  { %20 = vsyncpa [#allocation15], 0  ;;  %s1682_s30 = smov [#allocation5]  }
   0x6   :  { %s36_s10 = sshll.u32 %s1682_s30, 4  ;;  %s37_s10 = int_to_ptr.vmem [resolvable:$true] %s36_s10 }
   0x7   :  { %s1498_s11 = scalar_lea.vmem %s37_s10, 32768  ;;  %p1503_p1 = scmp.lt.s32.totalorder %s37_s10, %s37_s10 }
   0x8   :  { %p1499_p0 = scmp.ne.s32.totalorder %s37_s10, %s1498_s11  ;;  %p1504_p2 = scmp.lt.s32.totalorder %s1498_s11, %s1498_s11 }
   0xa   :  { %p1505_p3 = por %p1504_p2, %p1503_p1 }
   0xc   :  { %p1506_p4 = pnand %p1505_p3, %p1499_p0 }
   0xe   :  { %1509 = shalt.err (!%p1506_p4)
}
   0xf   :  { %s1683_s12 = smov 256   ;;  %s1684_s13 = smov 16  }
  0x10   :  { %42 = dma.hbm_to_vmem [thread:$0]  %s1801_s1, 32768, %s37_s10, [#allocation6], %s1683_s12, %s1683_s12, %s1684_s13  }
  0x11   :  { %s1685_s16 = smov [#allocation8]   ;;  %s1686_s18 = smov [#allocation2]  }
  0x12   :  { %s58_s17 = sshll.u32 %s1685_s16, 4  ;;  %s27_s19 = sshll.u32 %s1686_s18, 4  ;;  %s59_s17 = int_to_ptr.vmem [resolvable:$true] %s58_s17  ;;  %s28_s19 = int_to_ptr.vmem [resolvable:$true] %s27_s19 }
  0x13   :  { %s1518_s20 = scalar_lea.vmem %s59_s17, 8192  ;;  %p1523_p6 = scmp.lt.s32.totalorder %s59_s17, %s59_s17 }
  0x14   :  { %p1519_p5 = scmp.ne.s32.totalorder %s59_s17, %s1518_s20  ;;  %p1524_p7 = scmp.lt.s32.totalorder %s1518_s20, %s1518_s20 }
  0x16   :  { %p1525_p8 = por %p1524_p7, %p1523_p6 }
  0x18   :  { %p1526_p9 = pnand %p1525_p8, %p1519_p5 }
  0x1a   :  { %1529 = shalt.err (!%p1526_p9)
}
  0x1b   :  { %64 = dma.hbm_to_vmem [thread:$0]  %s1803_s3, 8192, %s59_s17, [#allocation9], %s1683_s12, %s1683_s12, %s1684_s13  }
  0x1c   :  { %s1538_s23 = scalar_lea.vmem %s28_s19, 1024  ;;  %p1543_p11 = scmp.lt.s32.totalorder %s28_s19, %s28_s19 }
  0x1d   :  { %p1539_p10 = scmp.ne.s32.totalorder %s28_s19, %s1538_s23  ;;  %p1544_p12 = scmp.lt.s32.totalorder %s1538_s23, %s1538_s23 }
  0x1f   :  { %p1545_p13 = por %p1544_p12, %p1543_p11 }
  0x21   :  { %p1546_p0 = pnand %p1545_p13, %p1539_p10 }
  0x23   :  { %1549 = shalt.err (!%p1546_p0)
}
  0x24   :  { %30 = dma.hbm_to_vmem [thread:$0]  %s1800_s0, 1024, %s28_s19, [#allocation3]  }
  0x25   :  { %s1687_s25 = smov [#allocation7]   ;;  %s1688_s27 = smov [#allocation10]  }
  0x26   :  { %s49_s26 = sshll.u32 %s1687_s25, 4  ;;  %s70_s28 = sshll.u32 %s1688_s27, 4  ;;  %s50_s26 = int_to_ptr.vmem [resolvable:$true] %s49_s26  ;;  %s71_s28 = int_to_ptr.vmem [resolvable:$true] %s70_s28 }
  0x27   :  { %s1558_s29 = scalar_lea.vmem %s50_s26, 32  ;;  %p1563_p2 = scmp.lt.s32.totalorder %s50_s26, %s50_s26 }
  0x28   :  { %p1559_p1 = scmp.ne.s32.totalorder %s50_s26, %s1558_s29  ;;  %p1564_p3 = scmp.lt.s32.totalorder %s1558_s29, %s1558_s29 }
  0x2a   :  { %p1565_p4 = por %p1564_p3, %p1563_p2 }
  0x2c   :  { %p1566_p5 = pnand %p1565_p4, %p1559_p1 }
  0x2e   :  { %1569 = shalt.err (!%p1566_p5)
}
  0x2f   :  { %52 = dma.hbm_to_vmem [thread:$0]  %s1802_s2, 32, %s50_s26, [#allocation6]  }
  0x30   :  { %s1578_s10 = scalar_lea.vmem %s71_s28, 32768  ;;  %p1583_p7 = scmp.lt.s32.totalorder %s71_s28, %s71_s28 }
  0x31   :  { %p1579_p6 = scmp.ne.s32.totalorder %s71_s28, %s1578_s10  ;;  %p1584_p8 = scmp.lt.s32.totalorder %s1578_s10, %s1578_s10 }
  0x33   :  { %p1585_p9 = por %p1584_p8, %p1583_p7 }
  0x35   :  { %p1586_p10 = pnand %p1585_p9, %p1579_p6 }
  0x37   :  { %1589 = shalt.err (!%p1586_p10)
}
  0x38   :  { %s1689_s0 = smov 1024   ;;  %s1690_s11 = smov 64  }
  0x39   :  { %76 = dma.hbm_to_vmem [thread:$0]  %s1804_s4, 32768, %s71_s28, [#allocation9], %s1689_s0, %s1689_s0, %s1690_s11  }
  0x3a   :  { %s1691_s14 = smov [#allocation11]  }
  0x3b   :  { %s85_s15 = sshll.u32 %s1691_s14, 4  ;;  %s86_s15 = int_to_ptr.vmem [resolvable:$true] %s85_s15 }
  0x3c   :  { %s1598_s16 = scalar_lea.vmem %s86_s15, 256  ;;  %p1603_p12 = scmp.lt.s32.totalorder %s86_s15, %s86_s15 }
  0x3d   :  { %p1599_p11 = scmp.ne.s32.totalorder %s86_s15, %s1598_s16  ;;  %p1604_p13 = scmp.lt.s32.totalorder %s1598_s16, %s1598_s16 }
  0x3f   :  { %p1605_p0 = por %p1604_p13, %p1603_p12 }
  0x41   :  { %p1606_p1 = pnand %p1605_p0, %p1599_p11 }
  0x43   :  { %1609 = shalt.err (!%p1606_p1)
}
  0x44   :  { %88 = dma.hbm_to_vmem [thread:$0]  %s1806_s6, 256, %s86_s15, [#allocation12]  }
  0x45   :  { %1670 = dma.done.wait [#allocation3], 1024  }
  0x46   :  { %1671 = vsyncadd [#allocation3], 4294966272 }
  0x47   :  { %1672 = dma.done.wait [#allocation6], 32800  }
  0x48   :  { %1673 = vsyncadd [#allocation6], 4294934496 }
  0x49   :  { %1674 = dma.done.wait [#allocation9], 40960  }
  0x4a   :  { %1675 = vsyncadd [#allocation9], 4294926336 }
  0x4b   :  { %1676 = dma.done.wait [#allocation12], 256  }
  0x4c   :  { %1677 = vsyncadd [#allocation12], 4294967040  ;;  %v146_v0 = vld [vmem:[#allocation5 + $0xf8] sm:$0xff]  ;;  %v145_v2 = vld [vmem:[#allocation5 + $0xf0] sm:$0xff]  ;;  %s1692_s4 = smov [#allocation14]  }
  0x4d   :  { %v210_v1 = vld [vmem:[#allocation5 + $0x2f8] sm:$0xff]  ;;  %383 = vmatprep.subr.mxu0 %v146_v0  ;;  %v209_v3 = vld [vmem:[#allocation5 + $0x2f0] sm:$0xff]  ;;  %v144_v4 = vld [vmem:[#allocation5 + $0xe8] sm:$0xff]  ;;  %s1436_s6 = sshll.u32 %s1692_s4, 4  ;;  %s1437_s6 = int_to_ptr.vmem [resolvable:$true] %s1436_s6 }
  0x4e   :  { %454 = vmatprep.subr.mxu1 %v210_v1  ;;  %v208_v5 = vld [vmem:[#allocation5 + $0x2e8] sm:$0xff]  ;;  %384 = vmatpush1.msra.mxu0 %v145_v2  ;;  %v143_v6 = vld [vmem:[#allocation5 + $0xe0] sm:$0xff]  ;;  %v142_v8 = vld [vmem:[#allocation5 + $0xd8] sm:$0xff]  ;;  %s1610_s18 = scalar_lea.vmem %s1437_s6, 256  ;;  %p1615_p3 = scmp.lt.s32.totalorder %s1437_s6, %s1437_s6 }
  0x4f   :  { %455 = vmatpush1.msra.mxu1 %v209_v3  ;;  %v207_v7 = vld [vmem:[#allocation5 + $0x2e0] sm:$0xff]  ;;  %385 = vmatprep.subr.mxu0 %v144_v4  ;;  %v206_v9 = vld [vmem:[#allocation5 + $0x2d8] sm:$0xff]  ;;  %v141_v10 = vld [vmem:[#allocation5 + $0xd0] sm:$0xff]  ;;  %p1611_p2 = scmp.ne.s32.totalorder %s1437_s6, %s1610_s18  ;;  %p1616_p4 = scmp.lt.s32.totalorder %s1610_s18, %s1610_s18 }
  0x50   :  { %456 = vmatprep.subr.mxu1 %v208_v5  ;;  %v205_v11 = vld [vmem:[#allocation5 + $0x2d0] sm:$0xff]  ;;  %386 = vmatpush1.msra.mxu0 %v143_v6  ;;  %v140_v12 = vld [vmem:[#allocation5 + $0xc8] sm:$0xff]  ;;  %v139_v14 = vld [vmem:[#allocation5 + $0xc0] sm:$0xff] }
  0x51   :  { %457 = vmatpush1.msra.mxu1 %v207_v7  ;;  %v204_v13 = vld [vmem:[#allocation5 + $0x2c8] sm:$0xff]  ;;  %387 = vmatprep.subr.mxu0 %v142_v8  ;;  %v203_v15 = vld [vmem:[#allocation5 + $0x2c0] sm:$0xff]  ;;  %v138_v16 = vld [vmem:[#allocation5 + $0xb8] sm:$0xff]  ;;  %p1617_p5 = por %p1616_p4, %p1615_p3 }
  0x52   :  { %458 = vmatprep.subr.mxu1 %v206_v9  ;;  %388 = vmatpush1.msra.mxu0 %v141_v10  ;;  %v202_v17 = vld [vmem:[#allocation5 + $0x2b8] sm:$0xff]  ;;  %v137_v18 = vld [vmem:[#allocation5 + $0xb0] sm:$0xff]  ;;  %v136_v20 = vld [vmem:[#allocation5 + $0xa8] sm:$0xff] }
  0x53   :  { %459 = vmatpush1.msra.mxu1 %v205_v11  ;;  %389 = vmatprep.subr.mxu0 %v140_v12  ;;  %v201_v19 = vld [vmem:[#allocation5 + $0x2b0] sm:$0xff]  ;;  %v200_v21 = vld [vmem:[#allocation5 + $0x2a8] sm:$0xff]  ;;  %v135_v22 = vld [vmem:[#allocation5 + $0xa0] sm:$0xff]  ;;  %p1618_p6 = pnand %p1617_p5, %p1611_p2 }
  0x54   :  { %460 = vmatprep.subr.mxu1 %v204_v13  ;;  %390 = vmatpush1.msra.mxu0 %v139_v14  ;;  %v199_v23 = vld [vmem:[#allocation5 + $0x2a0] sm:$0xff]  ;;  %v134_v24 = vld [vmem:[#allocation5 + $0x98] sm:$0xff]  ;;  %v133_v26 = vld [vmem:[#allocation5 + $0x90] sm:$0xff] }
  0x55   :  { %461 = vmatpush1.msra.mxu1 %v203_v15  ;;  %391 = vmatprep.subr.mxu0 %v138_v16  ;;  %v198_v25 = vld [vmem:[#allocation5 + $0x298] sm:$0xff]  ;;  %v197_v27 = vld [vmem:[#allocation5 + $0x290] sm:$0xff]  ;;  %v132_v28 = vld [vmem:[#allocation5 + $0x88] sm:$0xff] }
  0x56   :  { %462 = vmatprep.subr.mxu1 %v202_v17  ;;  %392 = vmatpush1.msra.mxu0 %v137_v18  ;;  %v196_v29 = vld [vmem:[#allocation5 + $0x288] sm:$0xff]  ;;  %v131_v30 = vld [vmem:[#allocation5 + $0x80] sm:$0xff]  ;;  %v130_v32 = vld [vmem:[#allocation5 + $0x78] sm:$0xff] }
  0x57   :  { %463 = vmatpush1.msra.mxu1 %v201_v19  ;;  %393 = vmatprep.subr.mxu0 %v136_v20  ;;  %v195_v31 = vld [vmem:[#allocation5 + $0x280] sm:$0xff]  ;;  %v194_v33 = vld [vmem:[#allocation5 + $0x278] sm:$0xff]  ;;  %v129_v34 = vld [vmem:[#allocation5 + $0x70] sm:$0xff] }
  0x58   :  { %464 = vmatprep.subr.mxu1 %v200_v21  ;;  %394 = vmatpush1.msra.mxu0 %v135_v22  ;;  %v193_v35 = vld [vmem:[#allocation5 + $0x270] sm:$0xff]  ;;  %v128_v36 = vld [vmem:[#allocation5 + $0x68] sm:$0xff]  ;;  %v127_v38 = vld [vmem:[#allocation5 + $0x60] sm:$0xff] }
  0x59   :  { %465 = vmatpush1.msra.mxu1 %v199_v23  ;;  %395 = vmatprep.subr.mxu0 %v134_v24  ;;  %v192_v37 = vld [vmem:[#allocation5 + $0x268] sm:$0xff]  ;;  %v191_v39 = vld [vmem:[#allocation5 + $0x260] sm:$0xff]  ;;  %v126_v40 = vld [vmem:[#allocation5 + $0x58] sm:$0xff] }
  0x5a   :  { %466 = vmatprep.subr.mxu1 %v198_v25  ;;  %396 = vmatpush1.msra.mxu0 %v133_v26  ;;  %v190_v41 = vld [vmem:[#allocation5 + $0x258] sm:$0xff]  ;;  %v125_v42 = vld [vmem:[#allocation5 + $0x50] sm:$0xff]  ;;  %v124_v44 = vld [vmem:[#allocation5 + $0x48] sm:$0xff] }
  0x5b   :  { %467 = vmatpush1.msra.mxu1 %v197_v27  ;;  %397 = vmatprep.subr.mxu0 %v132_v28  ;;  %v189_v43 = vld [vmem:[#allocation5 + $0x250] sm:$0xff]  ;;  %v188_v45 = vld [vmem:[#allocation5 + $0x248] sm:$0xff]  ;;  %v123_v46 = vld [vmem:[#allocation5 + $0x40] sm:$0xff] }
  0x5c   :  { %468 = vmatprep.subr.mxu1 %v196_v29  ;;  %398 = vmatpush1.msra.mxu0 %v131_v30  ;;  %v187_v47 = vld [vmem:[#allocation5 + $0x240] sm:$0xff]  ;;  %v122_v48 = vld [vmem:[#allocation5 + $0x38] sm:$0xff]  ;;  %v121_v50 = vld [vmem:[#allocation5 + $0x30] sm:$0xff] }
  0x5d   :  { %469 = vmatpush1.msra.mxu1 %v195_v31  ;;  %399 = vmatprep.subr.mxu0 %v130_v32  ;;  %v186_v49 = vld [vmem:[#allocation5 + $0x238] sm:$0xff]  ;;  %v185_v51 = vld [vmem:[#allocation5 + $0x230] sm:$0xff]  ;;  %v120_v52 = vld [vmem:[#allocation5 + $0x28] sm:$0xff] }
  0x5e   :  { %470 = vmatprep.subr.mxu1 %v194_v33  ;;  %400 = vmatpush1.msra.mxu0 %v129_v34  ;;  %v184_v53 = vld [vmem:[#allocation5 + $0x228] sm:$0xff]  ;;  %v119_v54 = vld [vmem:[#allocation5 + $0x20] sm:$0xff]  ;;  %v118_v56 = vld [vmem:[#allocation5 + $0x18] sm:$0xff] }
  0x5f   :  { %471 = vmatpush1.msra.mxu1 %v193_v35  ;;  %401 = vmatprep.subr.mxu0 %v128_v36  ;;  %v183_v55 = vld [vmem:[#allocation5 + $0x220] sm:$0xff]  ;;  %v182_v57 = vld [vmem:[#allocation5 + $0x218] sm:$0xff]  ;;  %v117_v58 = vld [vmem:[#allocation5 + $0x10] sm:$0xff] }
  0x60   :  { %472 = vmatprep.subr.mxu1 %v192_v37  ;;  %402 = vmatpush1.msra.mxu0 %v127_v38  ;;  %v181_v59 = vld [vmem:[#allocation5 + $0x210] sm:$0xff]  ;;  %v116_v60 = vld [vmem:[#allocation5 + $0x8] sm:$0xff]  ;;  %v115_v62 = vld [vmem:[#allocation5] sm:$0xff] }
  0x61   :  { %473 = vmatpush1.msra.mxu1 %v191_v39  ;;  %403 = vmatprep.subr.mxu0 %v126_v40  ;;  %v180_v61 = vld [vmem:[#allocation5 + $0x208] sm:$0xff]  ;;  %v179_v63 = vld [vmem:[#allocation5 + $0x200] sm:$0xff]  ;;  %v178_v0 = vld [vmem:[#allocation5 + $0x1f8] sm:$0xff] }
  0x62   :  { %474 = vmatprep.subr.mxu1 %v190_v41  ;;  %404 = vmatpush1.msra.mxu0 %v125_v42  ;;  %v242_v1 = vld [vmem:[#allocation5 + $0x3f8] sm:$0xff]  ;;  %v177_v2 = vld [vmem:[#allocation5 + $0x1f0] sm:$0xff]  ;;  %v176_v4 = vld [vmem:[#allocation5 + $0x1e8] sm:$0xff] }
  0x63   :  { %475 = vmatpush1.msra.mxu1 %v189_v43  ;;  %405 = vmatprep.subr.mxu0 %v124_v44  ;;  %v241_v3 = vld [vmem:[#allocation5 + $0x3f0] sm:$0xff]  ;;  %v240_v5 = vld [vmem:[#allocation5 + $0x3e8] sm:$0xff]  ;;  %v175_v6 = vld [vmem:[#allocation5 + $0x1e0] sm:$0xff] }
  0x64   :  { %476 = vmatprep.subr.mxu1 %v188_v45  ;;  %406 = vmatpush1.msra.mxu0 %v123_v46  ;;  %v239_v7 = vld [vmem:[#allocation5 + $0x3e0] sm:$0xff]  ;;  %v174_v8 = vld [vmem:[#allocation5 + $0x1d8] sm:$0xff]  ;;  %v173_v10 = vld [vmem:[#allocation5 + $0x1d0] sm:$0xff] }
  0x65   :  { %477 = vmatpush1.msra.mxu1 %v187_v47  ;;  %407 = vmatprep.subr.mxu0 %v122_v48  ;;  %v238_v9 = vld [vmem:[#allocation5 + $0x3d8] sm:$0xff]  ;;  %v237_v11 = vld [vmem:[#allocation5 + $0x3d0] sm:$0xff]  ;;  %v172_v12 = vld [vmem:[#allocation5 + $0x1c8] sm:$0xff] }
  0x66   :  { %478 = vmatprep.subr.mxu1 %v186_v49  ;;  %408 = vmatpush1.msra.mxu0 %v121_v50  ;;  %v236_v13 = vld [vmem:[#allocation5 + $0x3c8] sm:$0xff]  ;;  %v171_v14 = vld [vmem:[#allocation5 + $0x1c0] sm:$0xff]  ;;  %v170_v16 = vld [vmem:[#allocation5 + $0x1b8] sm:$0xff] }
  0x67   :  { %479 = vmatpush1.msra.mxu1 %v185_v51  ;;  %409 = vmatprep.subr.mxu0 %v120_v52  ;;  %v235_v15 = vld [vmem:[#allocation5 + $0x3c0] sm:$0xff]  ;;  %v234_v17 = vld [vmem:[#allocation5 + $0x3b8] sm:$0xff]  ;;  %v169_v18 = vld [vmem:[#allocation5 + $0x1b0] sm:$0xff] }
  0x68   :  { %480 = vmatprep.subr.mxu1 %v184_v53  ;;  %410 = vmatpush1.msra.mxu0 %v119_v54  ;;  %v233_v19 = vld [vmem:[#allocation5 + $0x3b0] sm:$0xff]  ;;  %v168_v20 = vld [vmem:[#allocation5 + $0x1a8] sm:$0xff]  ;;  %v167_v22 = vld [vmem:[#allocation5 + $0x1a0] sm:$0xff] }
  0x69   :  { %481 = vmatpush1.msra.mxu1 %v183_v55  ;;  %411 = vmatprep.subr.mxu0 %v118_v56  ;;  %v232_v21 = vld [vmem:[#allocation5 + $0x3a8] sm:$0xff]  ;;  %v231_v23 = vld [vmem:[#allocation5 + $0x3a0] sm:$0xff]  ;;  %v166_v24 = vld [vmem:[#allocation5 + $0x198] sm:$0xff] }
  0x6a   :  { %482 = vmatprep.subr.mxu1 %v182_v57  ;;  %412 = vmatpush1.msra.mxu0 %v117_v58  ;;  %v230_v25 = vld [vmem:[#allocation5 + $0x398] sm:$0xff]  ;;  %v165_v26 = vld [vmem:[#allocation5 + $0x190] sm:$0xff]  ;;  %v164_v28 = vld [vmem:[#allocation5 + $0x188] sm:$0xff] }
  0x6b   :  { %483 = vmatpush1.msra.mxu1 %v181_v59  ;;  %413 = vmatprep.subr.mxu0 %v116_v60  ;;  %v229_v27 = vld [vmem:[#allocation5 + $0x390] sm:$0xff]  ;;  %v228_v29 = vld [vmem:[#allocation5 + $0x388] sm:$0xff]  ;;  %v163_v30 = vld [vmem:[#allocation5 + $0x180] sm:$0xff] }
  0x6c   :  { %484 = vmatprep.subr.mxu1 %v180_v61  ;;  %414 = vmatpush1.msra.mxu0 %v115_v62  ;;  %v227_v31 = vld [vmem:[#allocation5 + $0x380] sm:$0xff]  ;;  %v162_v32 = vld [vmem:[#allocation5 + $0x178] sm:$0xff]  ;;  %v161_v34 = vld [vmem:[#allocation5 + $0x170] sm:$0xff] }
  0x6d   :  { %485 = vmatpush1.msra.mxu1 %v179_v63  ;;  %415 = vmatprep.subr.mxu0 %v178_v0  ;;  %v226_v33 = vld [vmem:[#allocation5 + $0x378] sm:$0xff]  ;;  %v225_v35 = vld [vmem:[#allocation5 + $0x370] sm:$0xff]  ;;  %v160_v36 = vld [vmem:[#allocation5 + $0x168] sm:$0xff] }
  0x6e   :  { %486 = vmatprep.subr.mxu1 %v242_v1  ;;  %416 = vmatpush2.msra.mxu0 %v177_v2  ;;  %v224_v37 = vld [vmem:[#allocation5 + $0x368] sm:$0xff]  ;;  %v159_v38 = vld [vmem:[#allocation5 + $0x160] sm:$0xff]  ;;  %v158_v40 = vld [vmem:[#allocation5 + $0x158] sm:$0xff] }
  0x6f   :  { %487 = vmatpush2.msra.mxu1 %v241_v3  ;;  %417 = vmatprep.subr.mxu0 %v176_v4  ;;  %v223_v39 = vld [vmem:[#allocation5 + $0x360] sm:$0xff]  ;;  %v222_v41 = vld [vmem:[#allocation5 + $0x358] sm:$0xff]  ;;  %v157_v42 = vld [vmem:[#allocation5 + $0x150] sm:$0xff] }
  0x70   :  { %488 = vmatprep.subr.mxu1 %v240_v5  ;;  %418 = vmatpush2.msra.mxu0 %v175_v6  ;;  %v221_v43 = vld [vmem:[#allocation5 + $0x350] sm:$0xff]  ;;  %v156_v44 = vld [vmem:[#allocation5 + $0x148] sm:$0xff]  ;;  %v155_v46 = vld [vmem:[#allocation5 + $0x140] sm:$0xff] }
  0x71   :  { %489 = vmatpush2.msra.mxu1 %v239_v7  ;;  %419 = vmatprep.subr.mxu0 %v174_v8  ;;  %v220_v45 = vld [vmem:[#allocation5 + $0x348] sm:$0xff]  ;;  %v219_v47 = vld [vmem:[#allocation5 + $0x340] sm:$0xff]  ;;  %v154_v48 = vld [vmem:[#allocation5 + $0x138] sm:$0xff] }
  0x72   :  { %490 = vmatprep.subr.mxu1 %v238_v9  ;;  %420 = vmatpush2.msra.mxu0 %v173_v10  ;;  %v218_v49 = vld [vmem:[#allocation5 + $0x338] sm:$0xff]  ;;  %v153_v50 = vld [vmem:[#allocation5 + $0x130] sm:$0xff]  ;;  %v152_v52 = vld [vmem:[#allocation5 + $0x128] sm:$0xff] }
  0x73   :  { %491 = vmatpush2.msra.mxu1 %v237_v11  ;;  %421 = vmatprep.subr.mxu0 %v172_v12  ;;  %v217_v51 = vld [vmem:[#allocation5 + $0x330] sm:$0xff]  ;;  %v216_v53 = vld [vmem:[#allocation5 + $0x328] sm:$0xff]  ;;  %v151_v54 = vld [vmem:[#allocation5 + $0x120] sm:$0xff] }
  0x74   :  { %492 = vmatprep.subr.mxu1 %v236_v13  ;;  %422 = vmatpush2.msra.mxu0 %v171_v14  ;;  %v215_v55 = vld [vmem:[#allocation5 + $0x320] sm:$0xff]  ;;  %v150_v56 = vld [vmem:[#allocation5 + $0x118] sm:$0xff]  ;;  %v149_v58 = vld [vmem:[#allocation5 + $0x110] sm:$0xff] }
  0x75   :  { %493 = vmatpush2.msra.mxu1 %v235_v15  ;;  %423 = vmatprep.subr.mxu0 %v170_v16  ;;  %v214_v57 = vld [vmem:[#allocation5 + $0x318] sm:$0xff]  ;;  %v213_v59 = vld [vmem:[#allocation5 + $0x310] sm:$0xff]  ;;  %v148_v60 = vld [vmem:[#allocation5 + $0x108] sm:$0xff] }
  0x76   :  { %494 = vmatprep.subr.mxu1 %v234_v17  ;;  %424 = vmatpush2.msra.mxu0 %v169_v18  ;;  %v212_v61 = vld [vmem:[#allocation5 + $0x308] sm:$0xff]  ;;  %v147_v62 = vld [vmem:[#allocation5 + $0x100] sm:$0xff]  ;;  %v110_v2 = vld [vmem:[#allocation2 + $0x18] sm:$0xff] }
  0x77   :  { %495 = vmatpush2.msra.mxu1 %v233_v19  ;;  %425 = vmatprep.subr.mxu0 %v168_v20  ;;  %v108_v63 = vld [vmem:[#allocation2 + $0x8] sm:$0xff]  ;;  %v211_v0 = vld [vmem:[#allocation5 + $0x300] sm:$0xff]  ;;  %v274_v3 = vld [vmem:[#allocation5 + $0x4f8] sm:$0xff] }
  0x78   :  { %496 = vmatprep.subr.mxu1 %v232_v21  ;;  %426 = vmatpush2.msra.mxu0 %v167_v22  ;;  %v107_v1 = vld [vmem:[#allocation2] sm:$0xff]  ;;  %v338_v4 = vld [vmem:[#allocation5 + $0x6f8] sm:$0xff]  ;;  %v109_v5 = vld [vmem:[#allocation2 + $0x10] sm:$0xff] }
  0x79   :  { %497 = vmatpush2.msra.mxu1 %v231_v23  ;;  %427 = vmatprep.subr.mxu0 %v166_v24  ;;  %v273_v6 = vld [vmem:[#allocation5 + $0x4f0] sm:$0xff]  ;;  %v272_v8 = vld [vmem:[#allocation5 + $0x4e8] sm:$0xff]  ;;  %v271_v10 = vld [vmem:[#allocation5 + $0x4e0] sm:$0xff] }
  0x7a   :  { %498 = vmatprep.subr.mxu1 %v230_v25  ;;  %428 = vmatpush2.msra.mxu0 %v165_v26  ;;  %v337_v7 = vld [vmem:[#allocation5 + $0x6f0] sm:$0xff]  ;;  %v336_v9 = vld [vmem:[#allocation5 + $0x6e8] sm:$0xff]  ;;  %v335_v11 = vld [vmem:[#allocation5 + $0x6e0] sm:$0xff] }
  0x7b   :  { %499 = vmatpush2.msra.mxu1 %v229_v27  ;;  %429 = vmatprep.subr.mxu0 %v164_v28  ;;  %v270_v12 = vld [vmem:[#allocation5 + $0x4d8] sm:$0xff]  ;;  %v269_v14 = vld [vmem:[#allocation5 + $0x4d0] sm:$0xff]  ;;  %v268_v16 = vld [vmem:[#allocation5 + $0x4c8] sm:$0xff] }
  0x7c   :  { %500 = vmatprep.subr.mxu1 %v228_v29  ;;  %430 = vmatpush2.msra.mxu0 %v163_v30  ;;  %v334_v13 = vld [vmem:[#allocation5 + $0x6d8] sm:$0xff]  ;;  %v333_v15 = vld [vmem:[#allocation5 + $0x6d0] sm:$0xff]  ;;  %v332_v17 = vld [vmem:[#allocation5 + $0x6c8] sm:$0xff] }
  0x7d   :  { %501 = vmatpush2.msra.mxu1 %v227_v31  ;;  %431 = vmatprep.subr.mxu0 %v162_v32  ;;  %v267_v18 = vld [vmem:[#allocation5 + $0x4c0] sm:$0xff]  ;;  %v266_v20 = vld [vmem:[#allocation5 + $0x4b8] sm:$0xff]  ;;  %v265_v22 = vld [vmem:[#allocation5 + $0x4b0] sm:$0xff] }
  0x7e   :  { %502 = vmatprep.subr.mxu1 %v226_v33  ;;  %432 = vmatpush2.msra.mxu0 %v161_v34  ;;  %v331_v19 = vld [vmem:[#allocation5 + $0x6c0] sm:$0xff]  ;;  %v330_v21 = vld [vmem:[#allocation5 + $0x6b8] sm:$0xff]  ;;  %v329_v23 = vld [vmem:[#allocation5 + $0x6b0] sm:$0xff] }
  0x7f   :  { %503 = vmatpush2.msra.mxu1 %v225_v35  ;;  %433 = vmatprep.subr.mxu0 %v160_v36  ;;  %v264_v24 = vld [vmem:[#allocation5 + $0x4a8] sm:$0xff]  ;;  %v263_v26 = vld [vmem:[#allocation5 + $0x4a0] sm:$0xff]  ;;  %v262_v28 = vld [vmem:[#allocation5 + $0x498] sm:$0xff] }
  0x80   :  { %504 = vmatprep.subr.mxu1 %v224_v37  ;;  %434 = vmatpush2.msra.mxu0 %v159_v38  ;;  %v328_v25 = vld [vmem:[#allocation5 + $0x6a8] sm:$0xff]  ;;  %v327_v27 = vld [vmem:[#allocation5 + $0x6a0] sm:$0xff]  ;;  %v326_v29 = vld [vmem:[#allocation5 + $0x698] sm:$0xff] }
  0x81   :  { %505 = vmatpush2.msra.mxu1 %v223_v39  ;;  %435 = vmatprep.subr.mxu0 %v158_v40  ;;  %v261_v30 = vld [vmem:[#allocation5 + $0x490] sm:$0xff]  ;;  %v260_v32 = vld [vmem:[#allocation5 + $0x488] sm:$0xff]  ;;  %v259_v34 = vld [vmem:[#allocation5 + $0x480] sm:$0xff] }
  0x82   :  { %506 = vmatprep.subr.mxu1 %v222_v41  ;;  %436 = vmatpush2.msra.mxu0 %v157_v42  ;;  %v325_v31 = vld [vmem:[#allocation5 + $0x690] sm:$0xff]  ;;  %v324_v33 = vld [vmem:[#allocation5 + $0x688] sm:$0xff]  ;;  %v323_v35 = vld [vmem:[#allocation5 + $0x680] sm:$0xff] }
  0x83   :  { %507 = vmatpush2.msra.mxu1 %v221_v43  ;;  %437 = vmatprep.subr.mxu0 %v156_v44  ;;  %v258_v36 = vld [vmem:[#allocation5 + $0x478] sm:$0xff]  ;;  %v257_v38 = vld [vmem:[#allocation5 + $0x470] sm:$0xff]  ;;  %v256_v40 = vld [vmem:[#allocation5 + $0x468] sm:$0xff] }
  0x84   :  { %508 = vmatprep.subr.mxu1 %v220_v45  ;;  %438 = vmatpush2.msra.mxu0 %v155_v46  ;;  %v322_v37 = vld [vmem:[#allocation5 + $0x678] sm:$0xff]  ;;  %v321_v39 = vld [vmem:[#allocation5 + $0x670] sm:$0xff]  ;;  %v320_v41 = vld [vmem:[#allocation5 + $0x668] sm:$0xff] }
  0x85   :  { %509 = vmatpush2.msra.mxu1 %v219_v47  ;;  %439 = vmatprep.subr.mxu0 %v154_v48  ;;  %v255_v42 = vld [vmem:[#allocation5 + $0x460] sm:$0xff]  ;;  %v254_v44 = vld [vmem:[#allocation5 + $0x458] sm:$0xff]  ;;  %v253_v46 = vld [vmem:[#allocation5 + $0x450] sm:$0xff] }
  0x86   :  { %510 = vmatprep.subr.mxu1 %v218_v49  ;;  %440 = vmatpush2.msra.mxu0 %v153_v50  ;;  %v319_v43 = vld [vmem:[#allocation5 + $0x660] sm:$0xff]  ;;  %v318_v45 = vld [vmem:[#allocation5 + $0x658] sm:$0xff]  ;;  %v317_v47 = vld [vmem:[#allocation5 + $0x650] sm:$0xff] }
  0x87   :  { %511 = vmatpush2.msra.mxu1 %v217_v51  ;;  %441 = vmatprep.subr.mxu0 %v152_v52  ;;  %v252_v48 = vld [vmem:[#allocation5 + $0x448] sm:$0xff]  ;;  %v251_v50 = vld [vmem:[#allocation5 + $0x440] sm:$0xff]  ;;  %v250_v52 = vld [vmem:[#allocation5 + $0x438] sm:$0xff] }
  0x88   :  { %512 = vmatprep.subr.mxu1 %v216_v53  ;;  %442 = vmatpush2.msra.mxu0 %v151_v54  ;;  %v316_v49 = vld [vmem:[#allocation5 + $0x648] sm:$0xff]  ;;  %v315_v51 = vld [vmem:[#allocation5 + $0x640] sm:$0xff]  ;;  %v314_v53 = vld [vmem:[#allocation5 + $0x638] sm:$0xff] }
  0x89   :  { %513 = vmatpush2.msra.mxu1 %v215_v55  ;;  %443 = vmatprep.subr.mxu0 %v150_v56  ;;  %v249_v54 = vld [vmem:[#allocation5 + $0x430] sm:$0xff]  ;;  %v248_v56 = vld [vmem:[#allocation5 + $0x428] sm:$0xff] }
  0x8a   :  { %514 = vmatprep.subr.mxu1 %v214_v57  ;;  %444 = vmatpush2.msra.mxu0 %v149_v58  ;;  %v313_v55 = vld [vmem:[#allocation5 + $0x630] sm:$0xff]  ;;  %v312_v57 = vld [vmem:[#allocation5 + $0x628] sm:$0xff]  ;;  %v247_v58 = vld [vmem:[#allocation5 + $0x420] sm:$0xff] }
  0x8b   :  { %515 = vmatpush2.msra.mxu1 %v213_v59  ;;  %445 = vmatprep.subr.mxu0 %v148_v60  ;;  %v311_v59 = vld [vmem:[#allocation5 + $0x620] sm:$0xff]  ;;  %v246_v60 = vld [vmem:[#allocation5 + $0x418] sm:$0xff] }
  0x8c   :  { %516 = vmatprep.subr.mxu1 %v212_v61  ;;  %446 = vmatpush2.msra.mxu0 %v147_v62  ;;  %v310_v61 = vld [vmem:[#allocation5 + $0x618] sm:$0xff]  ;;  %v245_v62 = vld [vmem:[#allocation5 + $0x410] sm:$0xff] }
  0x8d   :  { %447 = vmatprep.mubr.f32.mxu0 %v108_v63  ;;  %517 = vmatpush2.msra.mxu1 %v211_v0  ;;  %v309_v63 = vld [vmem:[#allocation5 + $0x610] sm:$0xff]  ;;  %v244_v0 = vld [vmem:[#allocation5 + $0x408] sm:$0xff] }
  0x8e   :  { %448 = vmatmul.mubr.f32.vlgmr.msra.gmra.mxu0 %v107_v1  ;;  %518 = vmatprep.mubr.f32.mxu1 %v110_v2  ;;  %v308_v1 = vld [vmem:[#allocation5 + $0x608] sm:$0xff]  ;;  %v243_v2 = vld [vmem:[#allocation5 + $0x400] sm:$0xff] }
  0x8f   :  { %525 = vmatprep.subr.mxu0 %v274_v3  ;;  %596 = vmatprep.subr.mxu1 %v338_v4  ;;  %v307_v3 = vld [vmem:[#allocation5 + $0x600] sm:$0xff]  ;;  %v306_v4 = vld [vmem:[#allocation5 + $0x5f8] sm:$0xff] }
  0x90   :  { %519 = vmatmul.mubr.f32.vlgmr.msra.gmra.mxu1 %v109_v5  ;;  %526 = vmatpush1.msra.mxu0 %v273_v6  ;;  %v370_v5 = vld [vmem:[#allocation5 + $0x7f8] sm:$0xff]  ;;  %v305_v6 = vld [vmem:[#allocation5 + $0x5f0] sm:$0xff] }
  0x91   :  { %597 = vmatpush1.msra.mxu1 %v337_v7  ;;  %527 = vmatprep.subr.mxu0 %v272_v8  ;;  %v369_v7 = vld [vmem:[#allocation5 + $0x7f0] sm:$0xff]  ;;  %v304_v8 = vld [vmem:[#allocation5 + $0x5e8] sm:$0xff] }
  0x92   :  { %598 = vmatprep.subr.mxu1 %v336_v9  ;;  %528 = vmatpush1.msra.mxu0 %v271_v10  ;;  %v368_v9 = vld [vmem:[#allocation5 + $0x7e8] sm:$0xff]  ;;  %v303_v10 = vld [vmem:[#allocation5 + $0x5e0] sm:$0xff] }
  0x93   :  { %599 = vmatpush1.msra.mxu1 %v335_v11  ;;  %529 = vmatprep.subr.mxu0 %v270_v12  ;;  %v367_v11 = vld [vmem:[#allocation5 + $0x7e0] sm:$0xff]  ;;  %v302_v12 = vld [vmem:[#allocation5 + $0x5d8] sm:$0xff] }
  0x94   :  { %600 = vmatprep.subr.mxu1 %v334_v13  ;;  %530 = vmatpush1.msra.mxu0 %v269_v14  ;;  %v366_v13 = vld [vmem:[#allocation5 + $0x7d8] sm:$0xff]  ;;  %v301_v14 = vld [vmem:[#allocation5 + $0x5d0] sm:$0xff] }
  0x95   :  { %601 = vmatpush1.msra.mxu1 %v333_v15  ;;  %531 = vmatprep.subr.mxu0 %v268_v16  ;;  %v365_v15 = vld [vmem:[#allocation5 + $0x7d0] sm:$0xff]  ;;  %v300_v16 = vld [vmem:[#allocation5 + $0x5c8] sm:$0xff] }
  0x96   :  { %602 = vmatprep.subr.mxu1 %v332_v17  ;;  %532 = vmatpush1.msra.mxu0 %v267_v18  ;;  %v364_v17 = vld [vmem:[#allocation5 + $0x7c8] sm:$0xff]  ;;  %v299_v18 = vld [vmem:[#allocation5 + $0x5c0] sm:$0xff] }
  0x97   :  { %603 = vmatpush1.msra.mxu1 %v331_v19  ;;  %533 = vmatprep.subr.mxu0 %v266_v20  ;;  %v363_v19 = vld [vmem:[#allocation5 + $0x7c0] sm:$0xff]  ;;  %v298_v20 = vld [vmem:[#allocation5 + $0x5b8] sm:$0xff] }
  0x98   :  { %604 = vmatprep.subr.mxu1 %v330_v21  ;;  %534 = vmatpush1.msra.mxu0 %v265_v22  ;;  %v362_v21 = vld [vmem:[#allocation5 + $0x7b8] sm:$0xff]  ;;  %v297_v22 = vld [vmem:[#allocation5 + $0x5b0] sm:$0xff] }
  0x99   :  { %605 = vmatpush1.msra.mxu1 %v329_v23  ;;  %535 = vmatprep.subr.mxu0 %v264_v24  ;;  %v361_v23 = vld [vmem:[#allocation5 + $0x7b0] sm:$0xff]  ;;  %v296_v24 = vld [vmem:[#allocation5 + $0x5a8] sm:$0xff] }
  0x9a   :  { %606 = vmatprep.subr.mxu1 %v328_v25  ;;  %536 = vmatpush1.msra.mxu0 %v263_v26  ;;  %v360_v25 = vld [vmem:[#allocation5 + $0x7a8] sm:$0xff]  ;;  %v295_v26 = vld [vmem:[#allocation5 + $0x5a0] sm:$0xff] }
  0x9b   :  { %607 = vmatpush1.msra.mxu1 %v327_v27  ;;  %537 = vmatprep.subr.mxu0 %v262_v28  ;;  %v359_v27 = vld [vmem:[#allocation5 + $0x7a0] sm:$0xff]  ;;  %v294_v28 = vld [vmem:[#allocation5 + $0x598] sm:$0xff] }
  0x9c   :  { %608 = vmatprep.subr.mxu1 %v326_v29  ;;  %538 = vmatpush1.msra.mxu0 %v261_v30  ;;  %v358_v29 = vld [vmem:[#allocation5 + $0x798] sm:$0xff]  ;;  %v293_v30 = vld [vmem:[#allocation5 + $0x590] sm:$0xff] }
  0x9d   :  { %609 = vmatpush1.msra.mxu1 %v325_v31  ;;  %539 = vmatprep.subr.mxu0 %v260_v32  ;;  %v357_v31 = vld [vmem:[#allocation5 + $0x790] sm:$0xff]  ;;  %v292_v32 = vld [vmem:[#allocation5 + $0x588] sm:$0xff] }
  0x9e   :  { %610 = vmatprep.subr.mxu1 %v324_v33  ;;  %540 = vmatpush1.msra.mxu0 %v259_v34  ;;  %v356_v33 = vld [vmem:[#allocation5 + $0x788] sm:$0xff]  ;;  %v291_v34 = vld [vmem:[#allocation5 + $0x580] sm:$0xff] }
  0x9f   :  { %611 = vmatpush1.msra.mxu1 %v323_v35  ;;  %541 = vmatprep.subr.mxu0 %v258_v36  ;;  %v355_v35 = vld [vmem:[#allocation5 + $0x780] sm:$0xff]  ;;  %v290_v36 = vld [vmem:[#allocation5 + $0x578] sm:$0xff] }
  0xa0   :  { %612 = vmatprep.subr.mxu1 %v322_v37  ;;  %542 = vmatpush1.msra.mxu0 %v257_v38  ;;  %v354_v37 = vld [vmem:[#allocation5 + $0x778] sm:$0xff]  ;;  %v289_v38 = vld [vmem:[#allocation5 + $0x570] sm:$0xff] }
  0xa1   :  { %613 = vmatpush1.msra.mxu1 %v321_v39  ;;  %543 = vmatprep.subr.mxu0 %v256_v40  ;;  %v353_v39 = vld [vmem:[#allocation5 + $0x770] sm:$0xff]  ;;  %v288_v40 = vld [vmem:[#allocation5 + $0x568] sm:$0xff] }
  0xa2   :  { %614 = vmatprep.subr.mxu1 %v320_v41  ;;  %544 = vmatpush1.msra.mxu0 %v255_v42  ;;  %v352_v41 = vld [vmem:[#allocation5 + $0x768] sm:$0xff]  ;;  %v287_v42 = vld [vmem:[#allocation5 + $0x560] sm:$0xff] }
  0xa3   :  { %615 = vmatpush1.msra.mxu1 %v319_v43  ;;  %545 = vmatprep.subr.mxu0 %v254_v44  ;;  %v351_v43 = vld [vmem:[#allocation5 + $0x760] sm:$0xff]  ;;  %v286_v44 = vld [vmem:[#allocation5 + $0x558] sm:$0xff] }
  0xa4   :  { %616 = vmatprep.subr.mxu1 %v318_v45  ;;  %546 = vmatpush1.msra.mxu0 %v253_v46  ;;  %v350_v45 = vld [vmem:[#allocation5 + $0x758] sm:$0xff]  ;;  %v285_v46 = vld [vmem:[#allocation5 + $0x550] sm:$0xff] }
  0xa5   :  { %617 = vmatpush1.msra.mxu1 %v317_v47  ;;  %547 = vmatprep.subr.mxu0 %v252_v48  ;;  %v349_v47 = vld [vmem:[#allocation5 + $0x750] sm:$0xff]  ;;  %v284_v48 = vld [vmem:[#allocation5 + $0x548] sm:$0xff] }
  0xa6   :  { %618 = vmatprep.subr.mxu1 %v316_v49  ;;  %548 = vmatpush1.msra.mxu0 %v251_v50  ;;  %v348_v49 = vld [vmem:[#allocation5 + $0x748] sm:$0xff]  ;;  %v283_v50 = vld [vmem:[#allocation5 + $0x540] sm:$0xff] }
  0xa7   :  { %619 = vmatpush1.msra.mxu1 %v315_v51  ;;  %549 = vmatprep.subr.mxu0 %v250_v52  ;;  %v347_v51 = vld [vmem:[#allocation5 + $0x740] sm:$0xff]  ;;  %v282_v52 = vld [vmem:[#allocation5 + $0x538] sm:$0xff] }
  0xa8   :  { %620 = vmatprep.subr.mxu1 %v314_v53  ;;  %550 = vmatpush1.msra.mxu0 %v249_v54  ;;  %v346_v53 = vld [vmem:[#allocation5 + $0x738] sm:$0xff]  ;;  %v281_v54 = vld [vmem:[#allocation5 + $0x530] sm:$0xff] }
  0xa9   :  { %621 = vmatpush1.msra.mxu1 %v313_v55  ;;  %551 = vmatprep.subr.mxu0 %v248_v56  ;;  %v345_v55 = vld [vmem:[#allocation5 + $0x730] sm:$0xff]  ;;  %v280_v56 = vld [vmem:[#allocation5 + $0x528] sm:$0xff] }
  0xaa   :  { %622 = vmatprep.subr.mxu1 %v312_v57  ;;  %552 = vmatpush1.msra.mxu0 %v247_v58  ;;  %v344_v57 = vld [vmem:[#allocation5 + $0x728] sm:$0xff]  ;;  %v279_v58 = vld [vmem:[#allocation5 + $0x520] sm:$0xff] }
  0xab   :  { %623 = vmatpush1.msra.mxu1 %v311_v59  ;;  %553 = vmatprep.subr.mxu0 %v246_v60  ;;  %v343_v59 = vld [vmem:[#allocation5 + $0x720] sm:$0xff]  ;;  %v278_v60 = vld [vmem:[#allocation5 + $0x518] sm:$0xff] }
  0xac   :  { %624 = vmatprep.subr.mxu1 %v310_v61  ;;  %554 = vmatpush1.msra.mxu0 %v245_v62  ;;  %v342_v61 = vld [vmem:[#allocation5 + $0x718] sm:$0xff]  ;;  %v277_v62 = vld [vmem:[#allocation5 + $0x510] sm:$0xff] }
  0xad   :  { %625 = vmatpush1.msra.mxu1 %v309_v63  ;;  %555 = vmatprep.subr.mxu0 %v244_v0  ;;  %v341_v63 = vld [vmem:[#allocation5 + $0x710] sm:$0xff]  ;;  %v276_v0 = vld [vmem:[#allocation5 + $0x508] sm:$0xff] }
  0xae   :  { %626 = vmatprep.subr.mxu1 %v308_v1  ;;  %556 = vmatpush1.msra.mxu0 %v243_v2  ;;  %v340_v1 = vld [vmem:[#allocation5 + $0x708] sm:$0xff]  ;;  %v275_v2 = vld [vmem:[#allocation5 + $0x500] sm:$0xff] }
  0xaf   :  { %627 = vmatpush1.msra.mxu1 %v307_v3  ;;  %557 = vmatprep.subr.mxu0 %v306_v4  ;;  %v112_v3 = vld [vmem:[#allocation2 + $0x28] sm:$0xff]  ;;  %v339_v4 = vld [vmem:[#allocation5 + $0x700] sm:$0xff] }
  0xb0   :  { %628 = vmatprep.subr.mxu1 %v370_v5  ;;  %558 = vmatpush2.msra.mxu0 %v305_v6  ;;  %v114_v5 = vld [vmem:[#allocation2 + $0x38] sm:$0xff]  ;;  %v111_v6 = vld [vmem:[#allocation2 + $0x20] sm:$0xff] }
  0xb1   :  { %629 = vmatpush2.msra.mxu1 %v369_v7  ;;  %559 = vmatprep.subr.mxu0 %v304_v8  ;;  %v113_v7 = vld [vmem:[#allocation2 + $0x30] sm:$0xff]  ;;  %v716_v8 = vld [vmem:[#allocation8 + $0xf8] sm:$0xff] }
  0xb2   :  { %630 = vmatprep.subr.mxu1 %v368_v9  ;;  %560 = vmatpush2.msra.mxu0 %v303_v10  ;;  %v715_v9 = vld [vmem:[#allocation8 + $0xf0] sm:$0xff]  ;;  %v714_v10 = vld [vmem:[#allocation8 + $0xe8] sm:$0xff] }
  0xb3   :  { %631 = vmatpush2.msra.mxu1 %v367_v11  ;;  %561 = vmatprep.subr.mxu0 %v302_v12  ;;  %v713_v11 = vld [vmem:[#allocation8 + $0xe0] sm:$0xff]  ;;  %v712_v12 = vld [vmem:[#allocation8 + $0xd8] sm:$0xff] }
  0xb4   :  { %632 = vmatprep.subr.mxu1 %v366_v13  ;;  %562 = vmatpush2.msra.mxu0 %v301_v14  ;;  %v711_v13 = vld [vmem:[#allocation8 + $0xd0] sm:$0xff]  ;;  %v710_v14 = vld [vmem:[#allocation8 + $0xc8] sm:$0xff] }
  0xb5   :  { %633 = vmatpush2.msra.mxu1 %v365_v15  ;;  %563 = vmatprep.subr.mxu0 %v300_v16  ;;  %v709_v15 = vld [vmem:[#allocation8 + $0xc0] sm:$0xff]  ;;  %v708_v16 = vld [vmem:[#allocation8 + $0xb8] sm:$0xff] }
  0xb6   :  { %634 = vmatprep.subr.mxu1 %v364_v17  ;;  %564 = vmatpush2.msra.mxu0 %v299_v18  ;;  %v707_v17 = vld [vmem:[#allocation8 + $0xb0] sm:$0xff]  ;;  %v706_v18 = vld [vmem:[#allocation8 + $0xa8] sm:$0xff] }
  0xb7   :  { %635 = vmatpush2.msra.mxu1 %v363_v19  ;;  %565 = vmatprep.subr.mxu0 %v298_v20  ;;  %v705_v19 = vld [vmem:[#allocation8 + $0xa0] sm:$0xff]  ;;  %v704_v20 = vld [vmem:[#allocation8 + $0x98] sm:$0xff] }
  0xb8   :  { %636 = vmatprep.subr.mxu1 %v362_v21  ;;  %566 = vmatpush2.msra.mxu0 %v297_v22  ;;  %v703_v21 = vld [vmem:[#allocation8 + $0x90] sm:$0xff]  ;;  %v702_v22 = vld [vmem:[#allocation8 + $0x88] sm:$0xff] }
  0xb9   :  { %637 = vmatpush2.msra.mxu1 %v361_v23  ;;  %567 = vmatprep.subr.mxu0 %v296_v24  ;;  %v701_v23 = vld [vmem:[#allocation8 + $0x80] sm:$0xff]  ;;  %v700_v24 = vld [vmem:[#allocation8 + $0x78] sm:$0xff] }
  0xba   :  { %638 = vmatprep.subr.mxu1 %v360_v25  ;;  %568 = vmatpush2.msra.mxu0 %v295_v26  ;;  %v699_v25 = vld [vmem:[#allocation8 + $0x70] sm:$0xff]  ;;  %v698_v26 = vld [vmem:[#allocation8 + $0x68] sm:$0xff] }
  0xbb   :  { %639 = vmatpush2.msra.mxu1 %v359_v27  ;;  %569 = vmatprep.subr.mxu0 %v294_v28  ;;  %v697_v27 = vld [vmem:[#allocation8 + $0x60] sm:$0xff]  ;;  %v696_v28 = vld [vmem:[#allocation8 + $0x58] sm:$0xff] }
  0xbc   :  { %640 = vmatprep.subr.mxu1 %v358_v29  ;;  %570 = vmatpush2.msra.mxu0 %v293_v30  ;;  %v695_v29 = vld [vmem:[#allocation8 + $0x50] sm:$0xff]  ;;  %v694_v30 = vld [vmem:[#allocation8 + $0x48] sm:$0xff] }
  0xbd   :  { %641 = vmatpush2.msra.mxu1 %v357_v31  ;;  %571 = vmatprep.subr.mxu0 %v292_v32  ;;  %v693_v31 = vld [vmem:[#allocation8 + $0x40] sm:$0xff]  ;;  %v692_v32 = vld [vmem:[#allocation8 + $0x38] sm:$0xff] }
  0xbe   :  { %642 = vmatprep.subr.mxu1 %v356_v33  ;;  %572 = vmatpush2.msra.mxu0 %v291_v34  ;;  %v691_v33 = vld [vmem:[#allocation8 + $0x30] sm:$0xff]  ;;  %v690_v34 = vld [vmem:[#allocation8 + $0x28] sm:$0xff] }
  0xbf   :  { %643 = vmatpush2.msra.mxu1 %v355_v35  ;;  %573 = vmatprep.subr.mxu0 %v290_v36  ;;  %v689_v35 = vld [vmem:[#allocation8 + $0x20] sm:$0xff]  ;;  %v688_v36 = vld [vmem:[#allocation8 + $0x18] sm:$0xff] }
  0xc0   :  { %644 = vmatprep.subr.mxu1 %v354_v37  ;;  %574 = vmatpush2.msra.mxu0 %v289_v38  ;;  %v687_v37 = vld [vmem:[#allocation8 + $0x10] sm:$0xff]  ;;  %v686_v38 = vld [vmem:[#allocation8 + $0x8] sm:$0xff] }
  0xc1   :  { %645 = vmatpush2.msra.mxu1 %v353_v39  ;;  %575 = vmatprep.subr.mxu0 %v288_v40  ;;  %v685_v39 = vld [vmem:[#allocation8] sm:$0xff]  ;;  %v748_v40 = vld [vmem:[#allocation8 + $0x1f8] sm:$0xff] }
  0xc2   :  { %646 = vmatprep.subr.mxu1 %v352_v41  ;;  %576 = vmatpush2.msra.mxu0 %v287_v42  ;;  %v747_v41 = vld [vmem:[#allocation8 + $0x1f0] sm:$0xff]  ;;  %v746_v42 = vld [vmem:[#allocation8 + $0x1e8] sm:$0xff] }
  0xc3   :  { %647 = vmatpush2.msra.mxu1 %v351_v43  ;;  %577 = vmatprep.subr.mxu0 %v286_v44  ;;  %v745_v43 = vld [vmem:[#allocation8 + $0x1e0] sm:$0xff]  ;;  %v744_v44 = vld [vmem:[#allocation8 + $0x1d8] sm:$0xff] }
  0xc4   :  { %648 = vmatprep.subr.mxu1 %v350_v45  ;;  %578 = vmatpush2.msra.mxu0 %v285_v46  ;;  %v743_v45 = vld [vmem:[#allocation8 + $0x1d0] sm:$0xff]  ;;  %v742_v46 = vld [vmem:[#allocation8 + $0x1c8] sm:$0xff] }
  0xc5   :  { %649 = vmatpush2.msra.mxu1 %v349_v47  ;;  %579 = vmatprep.subr.mxu0 %v284_v48  ;;  %v741_v47 = vld [vmem:[#allocation8 + $0x1c0] sm:$0xff]  ;;  %v740_v48 = vld [vmem:[#allocation8 + $0x1b8] sm:$0xff] }
  0xc6   :  { %650 = vmatprep.subr.mxu1 %v348_v49  ;;  %580 = vmatpush2.msra.mxu0 %v283_v50  ;;  %v739_v49 = vld [vmem:[#allocation8 + $0x1b0] sm:$0xff]  ;;  %v738_v50 = vld [vmem:[#allocation8 + $0x1a8] sm:$0xff] }
  0xc7   :  { %651 = vmatpush2.msra.mxu1 %v347_v51  ;;  %581 = vmatprep.subr.mxu0 %v282_v52  ;;  %v737_v51 = vld [vmem:[#allocation8 + $0x1a0] sm:$0xff]  ;;  %v736_v52 = vld [vmem:[#allocation8 + $0x198] sm:$0xff] }
  0xc8   :  { %652 = vmatprep.subr.mxu1 %v346_v53  ;;  %582 = vmatpush2.msra.mxu0 %v281_v54  ;;  %v735_v53 = vld [vmem:[#allocation8 + $0x190] sm:$0xff]  ;;  %v734_v54 = vld [vmem:[#allocation8 + $0x188] sm:$0xff] }
  0xc9   :  { %653 = vmatpush2.msra.mxu1 %v345_v55  ;;  %583 = vmatprep.subr.mxu0 %v280_v56  ;;  %v733_v55 = vld [vmem:[#allocation8 + $0x180] sm:$0xff]  ;;  %v732_v56 = vld [vmem:[#allocation8 + $0x178] sm:$0xff] }
  0xca   :  { %654 = vmatprep.subr.mxu1 %v344_v57  ;;  %584 = vmatpush2.msra.mxu0 %v279_v58  ;;  %v731_v57 = vld [vmem:[#allocation8 + $0x170] sm:$0xff]  ;;  %v730_v58 = vld [vmem:[#allocation8 + $0x168] sm:$0xff] }
  0xcb   :  { %655 = vmatpush2.msra.mxu1 %v343_v59  ;;  %585 = vmatprep.subr.mxu0 %v278_v60  ;;  %v729_v59 = vld [vmem:[#allocation8 + $0x160] sm:$0xff]  ;;  %v728_v60 = vld [vmem:[#allocation8 + $0x158] sm:$0xff] }
  0xcc   :  { %656 = vmatprep.subr.mxu1 %v342_v61  ;;  %586 = vmatpush2.msra.mxu0 %v277_v62  ;;  %v727_v61 = vld [vmem:[#allocation8 + $0x150] sm:$0xff]  ;;  %v726_v62 = vld [vmem:[#allocation8 + $0x148] sm:$0xff] }
  0xcd   :  { %657 = vmatpush2.msra.mxu1 %v341_v63  ;;  %587 = vmatprep.subr.mxu0 %v276_v0  ;;  %v725_v63 = vld [vmem:[#allocation8 + $0x140] sm:$0xff]  ;;  %v724_v0 = vld [vmem:[#allocation8 + $0x138] sm:$0xff] }
  0xce   :  { %658 = vmatprep.subr.mxu1 %v340_v1  ;;  %588 = vmatpush2.msra.mxu0 %v275_v2  ;;  %v723_v1 = vld [vmem:[#allocation8 + $0x130] sm:$0xff]  ;;  %v722_v2 = vld [vmem:[#allocation8 + $0x128] sm:$0xff] }
  0xcf   :  { %589 = vmatprep.mubr.f32.mxu0 %v112_v3  ;;  %659 = vmatpush2.msra.mxu1 %v339_v4  ;;  %v721_v3 = vld [vmem:[#allocation8 + $0x120] sm:$0xff]  ;;  %v720_v4 = vld [vmem:[#allocation8 + $0x118] sm:$0xff] }
  0xd0   :  { %660 = vmatprep.mubr.f32.mxu1 %v114_v5  ;;  %590 = vmatmul.mubr.f32.vlgmr.msra.gmra.mxu0 %v111_v6  ;;  %v719_v5 = vld [vmem:[#allocation8 + $0x110] sm:$0xff]  ;;  %v718_v6 = vld [vmem:[#allocation8 + $0x108] sm:$0xff] }
  0xd1   :  { %661 = vmatmul.mubr.f32.vlgmr.msra.gmra.mxu1 %v113_v7  ;;  %749 = vmatprep.subr.mxu0 %v716_v8  ;;  %v717_v7 = vld [vmem:[#allocation8 + $0x100] sm:$0xff]  ;;  %v951_v8 = vld [vmem:[#allocation10 + $0x3c8] sm:$0xff] }
  0xd2   :  { %750 = vmatpush1.msra.mxu0 %v715_v9  ;;  %v953_v9 = vld [vmem:[#allocation10 + $0x3d8] sm:$0xff]  ;;  %1128 = vmatprep.subr.mxu1 %v951_v8 }
  0xd3   :  { %751 = vmatprep.subr.mxu0 %v714_v10  ;;  %v950_v10 = vld [vmem:[#allocation10 + $0x3c0] sm:$0xff] }
  0xd4   :  { %752 = vmatpush1.msra.mxu0 %v713_v11  ;;  %v943_v11 = vld [vmem:[#allocation10 + $0x388] sm:$0xff]  ;;  %1129 = vmatpush1.msra.mxu1 %v950_v10 }
  0xd5   :  { %753 = vmatprep.subr.mxu0 %v712_v12  ;;  %v942_v12 = vld [vmem:[#allocation10 + $0x380] sm:$0xff]  ;;  %1130 = vmatprep.subr.mxu1 %v943_v11 }
  0xd6   :  { %754 = vmatpush1.msra.mxu0 %v711_v13  ;;  %v935_v13 = vld [vmem:[#allocation10 + $0x348] sm:$0xff]  ;;  %1131 = vmatpush1.msra.mxu1 %v942_v12 }
  0xd7   :  { %755 = vmatprep.subr.mxu0 %v710_v14  ;;  %v934_v14 = vld [vmem:[#allocation10 + $0x340] sm:$0xff]  ;;  %1132 = vmatprep.subr.mxu1 %v935_v13 }
  0xd8   :  { %756 = vmatpush1.msra.mxu0 %v709_v15  ;;  %v927_v15 = vld [vmem:[#allocation10 + $0x308] sm:$0xff]  ;;  %1133 = vmatpush1.msra.mxu1 %v934_v14 }
  0xd9   :  { %757 = vmatprep.subr.mxu0 %v708_v16  ;;  %v926_v16 = vld [vmem:[#allocation10 + $0x300] sm:$0xff]  ;;  %1134 = vmatprep.subr.mxu1 %v927_v15 }
  0xda   :  { %758 = vmatpush1.msra.mxu0 %v707_v17  ;;  %v919_v17 = vld [vmem:[#allocation10 + $0x2c8] sm:$0xff]  ;;  %1135 = vmatpush1.msra.mxu1 %v926_v16 }
  0xdb   :  { %759 = vmatprep.subr.mxu0 %v706_v18  ;;  %v918_v18 = vld [vmem:[#allocation10 + $0x2c0] sm:$0xff]  ;;  %1136 = vmatprep.subr.mxu1 %v919_v17 }
  0xdc   :  { %760 = vmatpush1.msra.mxu0 %v705_v19  ;;  %v911_v19 = vld [vmem:[#allocation10 + $0x288] sm:$0xff]  ;;  %1137 = vmatpush1.msra.mxu1 %v918_v18 }
  0xdd   :  { %761 = vmatprep.subr.mxu0 %v704_v20  ;;  %v910_v20 = vld [vmem:[#allocation10 + $0x280] sm:$0xff]  ;;  %1138 = vmatprep.subr.mxu1 %v911_v19 }
  0xde   :  { %762 = vmatpush1.msra.mxu0 %v703_v21  ;;  %v903_v21 = vld [vmem:[#allocation10 + $0x248] sm:$0xff]  ;;  %1139 = vmatpush1.msra.mxu1 %v910_v20 }
  0xdf   :  { %763 = vmatprep.subr.mxu0 %v702_v22  ;;  %v902_v22 = vld [vmem:[#allocation10 + $0x240] sm:$0xff]  ;;  %1140 = vmatprep.subr.mxu1 %v903_v21 }
  0xe0   :  { %764 = vmatpush1.msra.mxu0 %v701_v23  ;;  %v895_v23 = vld [vmem:[#allocation10 + $0x208] sm:$0xff]  ;;  %1141 = vmatpush1.msra.mxu1 %v902_v22 }
  0xe1   :  { %765 = vmatprep.subr.mxu0 %v700_v24  ;;  %v894_v24 = vld [vmem:[#allocation10 + $0x200] sm:$0xff]  ;;  %1142 = vmatprep.subr.mxu1 %v895_v23 }
  0xe2   :  { %766 = vmatpush1.msra.mxu0 %v699_v25  ;;  %v887_v25 = vld [vmem:[#allocation10 + $0x1c8] sm:$0xff]  ;;  %1143 = vmatpush1.msra.mxu1 %v894_v24 }
  0xe3   :  { %767 = vmatprep.subr.mxu0 %v698_v26  ;;  %v886_v26 = vld [vmem:[#allocation10 + $0x1c0] sm:$0xff]  ;;  %1144 = vmatprep.subr.mxu1 %v887_v25 }
  0xe4   :  { %768 = vmatpush1.msra.mxu0 %v697_v27  ;;  %v879_v27 = vld [vmem:[#allocation10 + $0x188] sm:$0xff]  ;;  %1145 = vmatpush1.msra.mxu1 %v886_v26 }
  0xe5   :  { %769 = vmatprep.subr.mxu0 %v696_v28  ;;  %v878_v28 = vld [vmem:[#allocation10 + $0x180] sm:$0xff]  ;;  %1146 = vmatprep.subr.mxu1 %v879_v27 }
  0xe6   :  { %770 = vmatpush1.msra.mxu0 %v695_v29  ;;  %v871_v29 = vld [vmem:[#allocation10 + $0x148] sm:$0xff]  ;;  %1147 = vmatpush1.msra.mxu1 %v878_v28 }
  0xe7   :  { %771 = vmatprep.subr.mxu0 %v694_v30  ;;  %v870_v30 = vld [vmem:[#allocation10 + $0x140] sm:$0xff]  ;;  %1148 = vmatprep.subr.mxu1 %v871_v29 }
  0xe8   :  { %772 = vmatpush1.msra.mxu0 %v693_v31  ;;  %v863_v31 = vld [vmem:[#allocation10 + $0x108] sm:$0xff]  ;;  %1149 = vmatpush1.msra.mxu1 %v870_v30 }
  0xe9   :  { %773 = vmatprep.subr.mxu0 %v692_v32  ;;  %v862_v32 = vld [vmem:[#allocation10 + $0x100] sm:$0xff]  ;;  %1150 = vmatprep.subr.mxu1 %v863_v31 }
  0xea   :  { %774 = vmatpush1.msra.mxu0 %v691_v33  ;;  %v855_v33 = vld [vmem:[#allocation10 + $0xc8] sm:$0xff]  ;;  %1151 = vmatpush1.msra.mxu1 %v862_v32 }
  0xeb   :  { %775 = vmatprep.subr.mxu0 %v690_v34  ;;  %v854_v34 = vld [vmem:[#allocation10 + $0xc0] sm:$0xff]  ;;  %1152 = vmatprep.subr.mxu1 %v855_v33 }
  0xec   :  { %776 = vmatpush1.msra.mxu0 %v689_v35  ;;  %v847_v35 = vld [vmem:[#allocation10 + $0x88] sm:$0xff]  ;;  %1153 = vmatpush1.msra.mxu1 %v854_v34 }
  0xed   :  { %777 = vmatprep.subr.mxu0 %v688_v36  ;;  %v846_v36 = vld [vmem:[#allocation10 + $0x80] sm:$0xff]  ;;  %1154 = vmatprep.subr.mxu1 %v847_v35 }
  0xee   :  { %778 = vmatpush1.msra.mxu0 %v687_v37  ;;  %v839_v37 = vld [vmem:[#allocation10 + $0x48] sm:$0xff]  ;;  %1155 = vmatpush1.msra.mxu1 %v846_v36 }
  0xef   :  { %779 = vmatprep.subr.mxu0 %v686_v38  ;;  %v838_v38 = vld [vmem:[#allocation10 + $0x40] sm:$0xff]  ;;  %1156 = vmatprep.subr.mxu1 %v839_v37  ;;  %v952_v37 = vld [vmem:[#allocation10 + $0x3d0] sm:$0xff] }
  0xf0   :  { %780 = vmatpush1.msra.mxu0 %v685_v39  ;;  %v831_v39 = vld [vmem:[#allocation10 + $0x8] sm:$0xff]  ;;  %1157 = vmatpush1.msra.mxu1 %v838_v38  ;;  %v945_v38 = vld [vmem:[#allocation10 + $0x398] sm:$0xff] }
  0xf1   :  { %781 = vmatprep.subr.mxu0 %v748_v40  ;;  %v830_v40 = vld [vmem:[#allocation10] sm:$0xff]  ;;  %1158 = vmatprep.subr.mxu1 %v831_v39  ;;  %v944_v39 = vld [vmem:[#allocation10 + $0x390] sm:$0xff] }
  0xf2   :  { %782 = vmatpush2.msra.mxu0 %v747_v41  ;;  %v1079_v41 = vld [vmem:[#allocation10 + $0x7c8] sm:$0xff]  ;;  %1159 = vmatpush1.msra.mxu1 %v830_v40  ;;  %v937_v40 = vld [vmem:[#allocation10 + $0x358] sm:$0xff] }
  0xf3   :  { %783 = vmatprep.subr.mxu0 %v746_v42  ;;  %v1078_v42 = vld [vmem:[#allocation10 + $0x7c0] sm:$0xff]  ;;  %1160 = vmatprep.subr.mxu1 %v1079_v41  ;;  %v936_v41 = vld [vmem:[#allocation10 + $0x350] sm:$0xff] }
  0xf4   :  { %784 = vmatpush2.msra.mxu0 %v745_v43  ;;  %v1071_v43 = vld [vmem:[#allocation10 + $0x788] sm:$0xff]  ;;  %1161 = vmatpush2.msra.mxu1 %v1078_v42  ;;  %v929_v42 = vld [vmem:[#allocation10 + $0x318] sm:$0xff] }
  0xf5   :  { %785 = vmatprep.subr.mxu0 %v744_v44  ;;  %v1070_v44 = vld [vmem:[#allocation10 + $0x780] sm:$0xff]  ;;  %1162 = vmatprep.subr.mxu1 %v1071_v43  ;;  %v928_v43 = vld [vmem:[#allocation10 + $0x310] sm:$0xff] }
  0xf6   :  { %786 = vmatpush2.msra.mxu0 %v743_v45  ;;  %v1063_v45 = vld [vmem:[#allocation10 + $0x748] sm:$0xff]  ;;  %1163 = vmatpush2.msra.mxu1 %v1070_v44  ;;  %v921_v44 = vld [vmem:[#allocation10 + $0x2d8] sm:$0xff] }
  0xf7   :  { %787 = vmatprep.subr.mxu0 %v742_v46  ;;  %v1062_v46 = vld [vmem:[#allocation10 + $0x740] sm:$0xff]  ;;  %1164 = vmatprep.subr.mxu1 %v1063_v45  ;;  %v920_v45 = vld [vmem:[#allocation10 + $0x2d0] sm:$0xff] }
  0xf8   :  { %788 = vmatpush2.msra.mxu0 %v741_v47  ;;  %v1055_v47 = vld [vmem:[#allocation10 + $0x708] sm:$0xff]  ;;  %1165 = vmatpush2.msra.mxu1 %v1062_v46  ;;  %v913_v46 = vld [vmem:[#allocation10 + $0x298] sm:$0xff] }
  0xf9   :  { %789 = vmatprep.subr.mxu0 %v740_v48  ;;  %v1054_v48 = vld [vmem:[#allocation10 + $0x700] sm:$0xff]  ;;  %1166 = vmatprep.subr.mxu1 %v1055_v47  ;;  %v912_v47 = vld [vmem:[#allocation10 + $0x290] sm:$0xff] }
  0xfa   :  { %790 = vmatpush2.msra.mxu0 %v739_v49  ;;  %v1047_v49 = vld [vmem:[#allocation10 + $0x6c8] sm:$0xff]  ;;  %1167 = vmatpush2.msra.mxu1 %v1054_v48  ;;  %v905_v48 = vld [vmem:[#allocation10 + $0x258] sm:$0xff] }
  0xfb   :  { %791 = vmatprep.subr.mxu0 %v738_v50  ;;  %v1046_v50 = vld [vmem:[#allocation10 + $0x6c0] sm:$0xff]  ;;  %1168 = vmatprep.subr.mxu1 %v1047_v49  ;;  %v904_v49 = vld [vmem:[#allocation10 + $0x250] sm:$0xff] }
  0xfc   :  { %792 = vmatpush2.msra.mxu0 %v737_v51  ;;  %v1039_v51 = vld [vmem:[#allocation10 + $0x688] sm:$0xff]  ;;  %1169 = vmatpush2.msra.mxu1 %v1046_v50  ;;  %v897_v50 = vld [vmem:[#allocation10 + $0x218] sm:$0xff] }
  0xfd   :  { %793 = vmatprep.subr.mxu0 %v736_v52  ;;  %v1038_v52 = vld [vmem:[#allocation10 + $0x680] sm:$0xff]  ;;  %1170 = vmatprep.subr.mxu1 %v1039_v51  ;;  %v896_v51 = vld [vmem:[#allocation10 + $0x210] sm:$0xff] }
  0xfe   :  { %794 = vmatpush2.msra.mxu0 %v735_v53  ;;  %v1031_v53 = vld [vmem:[#allocation10 + $0x648] sm:$0xff]  ;;  %1171 = vmatpush2.msra.mxu1 %v1038_v52  ;;  %v889_v52 = vld [vmem:[#allocation10 + $0x1d8] sm:$0xff] }
  0xff   :  { %795 = vmatprep.subr.mxu0 %v734_v54  ;;  %v1030_v54 = vld [vmem:[#allocation10 + $0x640] sm:$0xff]  ;;  %1172 = vmatprep.subr.mxu1 %v1031_v53  ;;  %v888_v53 = vld [vmem:[#allocation10 + $0x1d0] sm:$0xff] }
 0x100   :  { %796 = vmatpush2.msra.mxu0 %v733_v55  ;;  %v1023_v55 = vld [vmem:[#allocation10 + $0x608] sm:$0xff]  ;;  %1173 = vmatpush2.msra.mxu1 %v1030_v54  ;;  %v881_v54 = vld [vmem:[#allocation10 + $0x198] sm:$0xff] }
 0x101   :  { %797 = vmatprep.subr.mxu0 %v732_v56  ;;  %v1022_v56 = vld [vmem:[#allocation10 + $0x600] sm:$0xff]  ;;  %1174 = vmatprep.subr.mxu1 %v1023_v55  ;;  %v880_v55 = vld [vmem:[#allocation10 + $0x190] sm:$0xff] }
 0x102   :  { %798 = vmatpush2.msra.mxu0 %v731_v57  ;;  %v1015_v57 = vld [vmem:[#allocation10 + $0x5c8] sm:$0xff]  ;;  %1175 = vmatpush2.msra.mxu1 %v1022_v56  ;;  %v873_v56 = vld [vmem:[#allocation10 + $0x158] sm:$0xff] }
 0x103   :  { %799 = vmatprep.subr.mxu0 %v730_v58  ;;  %v1014_v58 = vld [vmem:[#allocation10 + $0x5c0] sm:$0xff]  ;;  %1176 = vmatprep.subr.mxu1 %v1015_v57  ;;  %v872_v57 = vld [vmem:[#allocation10 + $0x150] sm:$0xff] }
 0x104   :  { %800 = vmatpush2.msra.mxu0 %v729_v59  ;;  %v1007_v59 = vld [vmem:[#allocation10 + $0x588] sm:$0xff]  ;;  %1177 = vmatpush2.msra.mxu1 %v1014_v58  ;;  %v865_v58 = vld [vmem:[#allocation10 + $0x118] sm:$0xff] }
 0x105   :  { %801 = vmatprep.subr.mxu0 %v728_v60  ;;  %v1006_v60 = vld [vmem:[#allocation10 + $0x580] sm:$0xff]  ;;  %1178 = vmatprep.subr.mxu1 %v1007_v59  ;;  %v864_v59 = vld [vmem:[#allocation10 + $0x110] sm:$0xff] }
 0x106   :  { %802 = vmatpush2.msra.mxu0 %v727_v61  ;;  %v999_v61 = vld [vmem:[#allocation10 + $0x548] sm:$0xff]  ;;  %1179 = vmatpush2.msra.mxu1 %v1006_v60  ;;  %v857_v60 = vld [vmem:[#allocation10 + $0xd8] sm:$0xff] }
 0x107   :  { %803 = vmatprep.subr.mxu0 %v726_v62  ;;  %v998_v62 = vld [vmem:[#allocation10 + $0x540] sm:$0xff]  ;;  %1180 = vmatprep.subr.mxu1 %v999_v61  ;;  %v856_v61 = vld [vmem:[#allocation10 + $0xd0] sm:$0xff] }
 0x108   :  { %804 = vmatpush2.msra.mxu0 %v725_v63  ;;  %v991_v63 = vld [vmem:[#allocation10 + $0x508] sm:$0xff]  ;;  %1181 = vmatpush2.msra.mxu1 %v998_v62  ;;  %v849_v62 = vld [vmem:[#allocation10 + $0x98] sm:$0xff] }
 0x109   :  { %805 = vmatprep.subr.mxu0 %v724_v0  ;;  %v990_v0 = vld [vmem:[#allocation10 + $0x500] sm:$0xff]  ;;  %1182 = vmatprep.subr.mxu1 %v991_v63  ;;  %v848_v63 = vld [vmem:[#allocation10 + $0x90] sm:$0xff] }
 0x10a   :  { %806 = vmatpush2.msra.mxu0 %v723_v1  ;;  %v983_v1 = vld [vmem:[#allocation10 + $0x4c8] sm:$0xff]  ;;  %1183 = vmatpush2.msra.mxu1 %v990_v0  ;;  %v841_v0 = vld [vmem:[#allocation10 + $0x58] sm:$0xff] }
 0x10b   :  { %807 = vmatprep.subr.mxu0 %v722_v2  ;;  %1184 = vmatprep.subr.mxu1 %v983_v1  ;;  %v373_v2 = vlaneseq  ;;  %v840_v1 = vld [vmem:[#allocation10 + $0x50] sm:$0xff] }
 0x10c   :  { %808 = vmatpush2.msra.mxu0 %v721_v3 }
 0x10d   :  { %809 = vmatprep.subr.mxu0 %v720_v4  ;;  %v1763_v3 = vshrl.u32 %v373_v2, 7  ;;  %v833_v2 = vld [vmem:[#allocation10 + $0x18] sm:$0xff] }
 0x10e   :  { %810 = vmatpush2.msra.mxu0 %v719_v5  ;;  %v371_v5 = vld [vmem:[#allocation7] sm:$0x3] }
 0x10f   :  { %811 = vmatprep.subr.mxu0 %v718_v6  ;;  %v375_v4 = vsub.s32 0, %v1763_v3  ;;  %v379_v6 = vsub.s32 1, %v1763_v3 }
 0x110   :  { %812 = vmatpush2.msra.mxu0 %v717_v7 }
 0x111   :  { %1199 = vmatprep.subr.mxu0 %v953_v9  ;;  %v376_v8 = vrot.slane %v371_v5, %v375_v4  ;;  %v380_v9 = vrot.slane %v371_v5, %v379_v6  ;;  %v832_v5 = vld [vmem:[#allocation10 + $0x10] sm:$0xff] }
 0x14e   :  { %v449_v7 = vpop.f32.mrf.mxu0 }
 0x14f   :  { %v450_v12 = vadd.f32 %v449_v7, %v376_v8  ;;  %v1081_v7 = vld [vmem:[#allocation10 + $0x7d8] sm:$0xff]  ;;  %v1080_v8 = vld [vmem:[#allocation10 + $0x7d0] sm:$0xff] }
 0x150   :  { %v520_v10 = vpop.f32.mrf.mxu1  ;;  %v451_v11 = vpop.f32.mrf.mxu0 }
 0x151   :  { %v452_v13 = vadd.f32 %v451_v11, %v380_v9  ;;  %v521_v15 = vadd.f32 %v520_v10, %v450_v12  ;;  %v1073_v9 = vld [vmem:[#allocation10 + $0x798] sm:$0xff]  ;;  %v1072_v10 = vld [vmem:[#allocation10 + $0x790] sm:$0xff] }
 0x152   :  { %v522_v14 = vpop.f32.mrf.mxu1  ;;  %v1065_v11 = vld [vmem:[#allocation10 + $0x758] sm:$0xff]  ;;  %v1064_v12 = vld [vmem:[#allocation10 + $0x750] sm:$0xff] }
 0x153   :  { %v523_v18 = vadd.f32 %v522_v14, %v452_v13  ;;  %v1057_v13 = vld [vmem:[#allocation10 + $0x718] sm:$0xff]  ;;  %v1056_v14 = vld [vmem:[#allocation10 + $0x710] sm:$0xff] }
 0x190   :  { %v591_v16 = vpop.f32.mrf.mxu0 }
 0x191   :  { %v662_v17 = vpop.f32.mrf.mxu1  ;;  %v592_v19 = vadd.f32 %v591_v16, %v521_v15  ;;  %v1049_v15 = vld [vmem:[#allocation10 + $0x6d8] sm:$0xff]  ;;  %v1048_v16 = vld [vmem:[#allocation10 + $0x6d0] sm:$0xff] }
 0x192   :  { %v593_v20 = vpop.f32.mrf.mxu0 }
 0x193   :  { %v663_v21 = vadd.f32 %v662_v17, %v592_v19  ;;  %v594_v22 = vadd.f32 %v593_v20, %v523_v18  ;;  %v664_v23 = vpop.f32.mrf.mxu1  ;;  %v1041_v17 = vld [vmem:[#allocation10 + $0x698] sm:$0xff]  ;;  %v1040_v18 = vld [vmem:[#allocation10 + $0x690] sm:$0xff] }
 0x194   :  { %v1033_v19 = vld [vmem:[#allocation10 + $0x658] sm:$0xff]  ;;  %v1032_v20 = vld [vmem:[#allocation10 + $0x650] sm:$0xff] }
 0x195   :  { %v1465_v24 = vadd.f32 -0.5, %v663_v21  ;;  %v665_v25 = vadd.f32 %v664_v23, %v594_v22  ;;  %v1025_v21 = vld [vmem:[#allocation10 + $0x618] sm:$0xff]  ;;  %v1024_v22 = vld [vmem:[#allocation10 + $0x610] sm:$0xff] }
 0x196   :  { %v1017_v23 = vld [vmem:[#allocation10 + $0x5d8] sm:$0xff] }
 0x197   :  { %v1467_v26 = vmul.f32 -4.0, %v1465_v24  ;;  %v1466_v27 = vadd.f32 -0.5, %v665_v25  ;;  %v1016_v24 = vld [vmem:[#allocation10 + $0x5d0] sm:$0xff]  ;;  %v1009_v25 = vld [vmem:[#allocation10 + $0x598] sm:$0xff] }
 0x199   :  { %v673_v28 = vmul.f32 1.442695, %v1467_v26  ;;  %v1468_v29 = vmul.f32 -4.0, %v1466_v27  ;;  %v1008_v26 = vld [vmem:[#allocation10 + $0x590] sm:$0xff]  ;;  %v1001_v27 = vld [vmem:[#allocation10 + $0x558] sm:$0xff] }
 0x19b   :  { %1482 = vpow2.f32 %v673_v28  ;;  %v675_v30 = vmul.f32 1.442695, %v1468_v29  ;;  %v1000_v28 = vld [vmem:[#allocation10 + $0x550] sm:$0xff]  ;;  %v993_v29 = vld [vmem:[#allocation10 + $0x518] sm:$0xff] }
 0x19d   :  { %1484 = vpow2.f32 %v675_v30  ;;  %v992_v30 = vld [vmem:[#allocation10 + $0x510] sm:$0xff] }
 0x1a8   :  { %v1483_v31 = vpop.eup %1482 }
 0x1a9   :  { %v677_v32 = vadd.f32 1.0, %v1483_v31  ;;  %v985_v31 = vld [vmem:[#allocation10 + $0x4d8] sm:$0xff] }
 0x1aa   :  { %v1485_v33 = vpop.eup %1484 }
 0x1ab   :  { %1486 = vrcp.f32 %v677_v32  ;;  %v678_v34 = vadd.f32 1.0, %v1485_v33  ;;  %v982_v32 = vld [vmem:[#allocation10 + $0x4c0] sm:$0xff]  ;;  %v984_v33 = vld [vmem:[#allocation10 + $0x4d0] sm:$0xff] }
 0x1ac   :  { %1185 = vmatpush2.msra.mxu1 %v982_v32  ;;  %v885_v32 = vld [vmem:[#allocation10 + $0x1b8] sm:$0xff] }
 0x1ad   :  { %1488 = vrcp.f32 %v678_v34  ;;  %v975_v34 = vld [vmem:[#allocation10 + $0x488] sm:$0xff] }
 0x1ae   :  { %1186 = vmatprep.subr.mxu1 %v975_v34  ;;  %v884_v34 = vld [vmem:[#allocation10 + $0x1b0] sm:$0xff] }
 0x1b8   :  { %v1487_v35 = vpop.eup %1486 }
 0x1b9   :  { %683 = vst [vmem:[#allocation14] sm:$0xff] %v1487_v35 }
 0x1ba   :  { %v1489_v36 = vpop.eup %1488 }
 0x1bb   :  { %684 = vst [vmem:[#allocation14 + $0x8] sm:$0xff] %v1489_v36  ;;  %813 = vmatprep.mubr.f32.mxu0 %v1489_v36  ;;  %v974_v36 = vld [vmem:[#allocation10 + $0x480] sm:$0xff] }
 0x1bc   :  { %814 = vmatmul.mubr.f32.vlgmr.msra.gmra.mxu0 %v1487_v35  ;;  %v977_v35 = vld [vmem:[#allocation10 + $0x498] sm:$0xff]  ;;  %1187 = vmatpush2.msra.mxu1 %v974_v36 }
 0x1bd   :  { %1200 = vmatpush1.msra.mxu0 %v952_v37  ;;  %v976_v37 = vld [vmem:[#allocation10 + $0x490] sm:$0xff]  ;;  %v877_v36 = vld [vmem:[#allocation10 + $0x178] sm:$0xff] }
 0x1be   :  { %1201 = vmatprep.subr.mxu0 %v945_v38  ;;  %v967_v38 = vld [vmem:[#allocation10 + $0x448] sm:$0xff] }
 0x1bf   :  { %1202 = vmatpush1.msra.mxu0 %v944_v39  ;;  %v969_v39 = vld [vmem:[#allocation10 + $0x458] sm:$0xff]  ;;  %1188 = vmatprep.subr.mxu1 %v967_v38  ;;  %v876_v38 = vld [vmem:[#allocation10 + $0x170] sm:$0xff] }
 0x1c0   :  { %1203 = vmatprep.subr.mxu0 %v937_v40  ;;  %v966_v40 = vld [vmem:[#allocation10 + $0x440] sm:$0xff] }
 0x1c1   :  { %1204 = vmatpush1.msra.mxu0 %v936_v41  ;;  %v968_v41 = vld [vmem:[#allocation10 + $0x450] sm:$0xff]  ;;  %1189 = vmatpush2.msra.mxu1 %v966_v40  ;;  %v869_v40 = vld [vmem:[#allocation10 + $0x138] sm:$0xff] }
 0x1c2   :  { %1205 = vmatprep.subr.mxu0 %v929_v42  ;;  %v959_v42 = vld [vmem:[#allocation10 + $0x408] sm:$0xff] }
 0x1c3   :  { %1206 = vmatpush1.msra.mxu0 %v928_v43  ;;  %v961_v43 = vld [vmem:[#allocation10 + $0x418] sm:$0xff]  ;;  %1190 = vmatprep.subr.mxu1 %v959_v42  ;;  %v868_v42 = vld [vmem:[#allocation10 + $0x130] sm:$0xff] }
 0x1c4   :  { %1207 = vmatprep.subr.mxu0 %v921_v44  ;;  %v958_v44 = vld [vmem:[#allocation10 + $0x400] sm:$0xff] }
 0x1c5   :  { %1208 = vmatpush1.msra.mxu0 %v920_v45  ;;  %v960_v45 = vld [vmem:[#allocation10 + $0x410] sm:$0xff]  ;;  %1191 = vmatpush2.msra.mxu1 %v958_v44  ;;  %v861_v44 = vld [vmem:[#allocation10 + $0xf8] sm:$0xff] }
 0x1c6   :  { %1209 = vmatprep.subr.mxu0 %v913_v46  ;;  %v955_v46 = vld [vmem:[#allocation10 + $0x3e8] sm:$0xff] }
 0x1c7   :  { %1210 = vmatpush1.msra.mxu0 %v912_v47  ;;  %v957_v47 = vld [vmem:[#allocation10 + $0x3f8] sm:$0xff]  ;;  %1270 = vmatprep.subr.mxu1 %v955_v46  ;;  %v860_v46 = vld [vmem:[#allocation10 + $0xf0] sm:$0xff] }
 0x1c8   :  { %1211 = vmatprep.subr.mxu0 %v905_v48  ;;  %v822_v48 = vld [vmem:[#allocation11] sm:$0xff] }
 0x1c9   :  { %1212 = vmatpush1.msra.mxu0 %v904_v49  ;;  %v823_v49 = vld [vmem:[#allocation11 + $0x8] sm:$0xff] }
 0x1ca   :  { %1213 = vmatprep.subr.mxu0 %v897_v50  ;;  %v824_v50 = vmul.f32 0.25, %v822_v48  ;;  %v853_v48 = vld [vmem:[#allocation10 + $0xb8] sm:$0xff] }
 0x1cb   :  { %1214 = vmatpush1.msra.mxu0 %v896_v51 }
 0x1cc   :  { %1215 = vmatprep.subr.mxu0 %v889_v52 }
 0x1cd   :  { %1216 = vmatpush1.msra.mxu0 %v888_v53  ;;  %v825_v53 = vmul.f32 0.25, %v823_v49  ;;  %v850_v49 = vld [vmem:[#allocation10 + $0xa0] sm:$0xff] }
 0x1ce   :  { %1217 = vmatprep.subr.mxu0 %v881_v54 }
 0x1cf   :  { %1218 = vmatpush1.msra.mxu0 %v880_v55 }
 0x1d0   :  { %1219 = vmatprep.subr.mxu0 %v873_v56 }
 0x1d1   :  { %1220 = vmatpush1.msra.mxu0 %v872_v57 }
 0x1d2   :  { %1221 = vmatprep.subr.mxu0 %v865_v58  ;;  %v954_v58 = vld [vmem:[#allocation10 + $0x3e0] sm:$0xff] }
 0x1d3   :  { %1222 = vmatpush1.msra.mxu0 %v864_v59  ;;  %v956_v59 = vld [vmem:[#allocation10 + $0x3f0] sm:$0xff] }
 0x1d4   :  { %1223 = vmatprep.subr.mxu0 %v857_v60  ;;  %v947_v60 = vld [vmem:[#allocation10 + $0x3a8] sm:$0xff] }
 0x1d5   :  { %1224 = vmatpush1.msra.mxu0 %v856_v61  ;;  %v949_v61 = vld [vmem:[#allocation10 + $0x3b8] sm:$0xff] }
 0x1d6   :  { %1225 = vmatprep.subr.mxu0 %v849_v62  ;;  %v946_v62 = vld [vmem:[#allocation10 + $0x3a0] sm:$0xff] }
 0x1d7   :  { %1226 = vmatpush1.msra.mxu0 %v848_v63  ;;  %v948_v63 = vld [vmem:[#allocation10 + $0x3b0] sm:$0xff] }
 0x1d8   :  { %1227 = vmatprep.subr.mxu0 %v841_v0  ;;  %v939_v0 = vld [vmem:[#allocation10 + $0x368] sm:$0xff] }
 0x1d9   :  { %1228 = vmatpush1.msra.mxu0 %v840_v1  ;;  %v941_v1 = vld [vmem:[#allocation10 + $0x378] sm:$0xff] }
 0x1da   :  { %1229 = vmatprep.subr.mxu0 %v833_v2  ;;  %v938_v2 = vld [vmem:[#allocation10 + $0x360] sm:$0xff] }
 0x1db   :  { %1230 = vmatpush1.msra.mxu0 %v832_v5  ;;  %v940_v5 = vld [vmem:[#allocation10 + $0x370] sm:$0xff] }
 0x1dc   :  { %1231 = vmatprep.subr.mxu0 %v1081_v7  ;;  %v931_v7 = vld [vmem:[#allocation10 + $0x328] sm:$0xff] }
 0x1dd   :  { %1232 = vmatpush2.msra.mxu0 %v1080_v8  ;;  %v933_v8 = vld [vmem:[#allocation10 + $0x338] sm:$0xff] }
 0x1de   :  { %1233 = vmatprep.subr.mxu0 %v1073_v9  ;;  %v930_v9 = vld [vmem:[#allocation10 + $0x320] sm:$0xff] }
 0x1df   :  { %1234 = vmatpush2.msra.mxu0 %v1072_v10  ;;  %v932_v10 = vld [vmem:[#allocation10 + $0x330] sm:$0xff] }
 0x1e0   :  { %1235 = vmatprep.subr.mxu0 %v1065_v11  ;;  %v923_v11 = vld [vmem:[#allocation10 + $0x2e8] sm:$0xff] }
 0x1e1   :  { %1236 = vmatpush2.msra.mxu0 %v1064_v12  ;;  %v925_v12 = vld [vmem:[#allocation10 + $0x2f8] sm:$0xff] }
 0x1e2   :  { %1237 = vmatprep.subr.mxu0 %v1057_v13  ;;  %v922_v13 = vld [vmem:[#allocation10 + $0x2e0] sm:$0xff] }
 0x1e3   :  { %1238 = vmatpush2.msra.mxu0 %v1056_v14  ;;  %v924_v14 = vld [vmem:[#allocation10 + $0x2f0] sm:$0xff] }
 0x1e4   :  { %1239 = vmatprep.subr.mxu0 %v1049_v15  ;;  %v915_v15 = vld [vmem:[#allocation10 + $0x2a8] sm:$0xff] }
 0x1e5   :  { %1240 = vmatpush2.msra.mxu0 %v1048_v16  ;;  %v917_v16 = vld [vmem:[#allocation10 + $0x2b8] sm:$0xff] }
 0x1e6   :  { %1241 = vmatprep.subr.mxu0 %v1041_v17  ;;  %v914_v17 = vld [vmem:[#allocation10 + $0x2a0] sm:$0xff] }
 0x1e7   :  { %1242 = vmatpush2.msra.mxu0 %v1040_v18  ;;  %v916_v18 = vld [vmem:[#allocation10 + $0x2b0] sm:$0xff] }
 0x1e8   :  { %1243 = vmatprep.subr.mxu0 %v1033_v19  ;;  %v907_v19 = vld [vmem:[#allocation10 + $0x268] sm:$0xff] }
 0x1e9   :  { %1244 = vmatpush2.msra.mxu0 %v1032_v20  ;;  %v909_v20 = vld [vmem:[#allocation10 + $0x278] sm:$0xff] }
 0x1ea   :  { %1245 = vmatprep.subr.mxu0 %v1025_v21  ;;  %v906_v21 = vld [vmem:[#allocation10 + $0x260] sm:$0xff] }
 0x1eb   :  { %1246 = vmatpush2.msra.mxu0 %v1024_v22  ;;  %v908_v22 = vld [vmem:[#allocation10 + $0x270] sm:$0xff] }
 0x1ec   :  { %1247 = vmatprep.subr.mxu0 %v1017_v23  ;;  %v899_v23 = vld [vmem:[#allocation10 + $0x228] sm:$0xff] }
 0x1ed   :  { %1248 = vmatpush2.msra.mxu0 %v1016_v24  ;;  %v901_v24 = vld [vmem:[#allocation10 + $0x238] sm:$0xff] }
 0x1ee   :  { %1249 = vmatprep.subr.mxu0 %v1009_v25  ;;  %v898_v25 = vld [vmem:[#allocation10 + $0x220] sm:$0xff] }
 0x1ef   :  { %1250 = vmatpush2.msra.mxu0 %v1008_v26  ;;  %v900_v26 = vld [vmem:[#allocation10 + $0x230] sm:$0xff] }
 0x1f0   :  { %1251 = vmatprep.subr.mxu0 %v1001_v27  ;;  %v891_v27 = vld [vmem:[#allocation10 + $0x1e8] sm:$0xff] }
 0x1f1   :  { %1252 = vmatpush2.msra.mxu0 %v1000_v28  ;;  %v893_v28 = vld [vmem:[#allocation10 + $0x1f8] sm:$0xff] }
 0x1f2   :  { %1253 = vmatprep.subr.mxu0 %v993_v29  ;;  %v890_v29 = vld [vmem:[#allocation10 + $0x1e0] sm:$0xff] }
 0x1f3   :  { %1254 = vmatpush2.msra.mxu0 %v992_v30  ;;  %v892_v30 = vld [vmem:[#allocation10 + $0x1f0] sm:$0xff] }
 0x1f4   :  { %1255 = vmatprep.subr.mxu0 %v985_v31  ;;  %v883_v31 = vld [vmem:[#allocation10 + $0x1a8] sm:$0xff] }
 0x1f5   :  { %1256 = vmatpush2.msra.mxu0 %v984_v33  ;;  %v882_v33 = vld [vmem:[#allocation10 + $0x1a0] sm:$0xff] }
 0x1f6   :  { %1257 = vmatprep.subr.mxu0 %v977_v35  ;;  %v875_v35 = vld [vmem:[#allocation10 + $0x168] sm:$0xff] }
 0x1f7   :  { %1258 = vmatpush2.msra.mxu0 %v976_v37  ;;  %v874_v37 = vld [vmem:[#allocation10 + $0x160] sm:$0xff] }
 0x1f8   :  { %1259 = vmatprep.subr.mxu0 %v969_v39  ;;  %v867_v39 = vld [vmem:[#allocation10 + $0x128] sm:$0xff] }
 0x1f9   :  { %1260 = vmatpush2.msra.mxu0 %v968_v41  ;;  %v866_v41 = vld [vmem:[#allocation10 + $0x120] sm:$0xff] }
 0x1fa   :  { %1261 = vmatprep.subr.mxu0 %v961_v43  ;;  %v859_v43 = vld [vmem:[#allocation10 + $0xe8] sm:$0xff] }
 0x1fb   :  { %1262 = vmatpush2.msra.mxu0 %v960_v45  ;;  %v858_v45 = vld [vmem:[#allocation10 + $0xe0] sm:$0xff] }
 0x1fc   :  { %1341 = vmatprep.subr.mxu0 %v957_v47  ;;  %v851_v47 = vld [vmem:[#allocation10 + $0xa8] sm:$0xff] }
 0x27c   :  { %v815_v51 = vpop.f32.mrf.mxu0 }
 0x27d   :  { %v820_v52 = vmax.f32 %v815_v51, 0.0  ;;  %v843_v51 = vld [vmem:[#allocation10 + $0x68] sm:$0xff] }
 0x27e   :  { %v817_v54 = vpop.f32.mrf.mxu0 }
 0x27f   :  { %v1771_v55 = vadd.f32 %v824_v50, %v820_v52  ;;  %v821_v56 = vmax.f32 %v817_v54, 0.0  ;;  %v852_v50 = vld [vmem:[#allocation10 + $0xb0] sm:$0xff]  ;;  %v845_v52 = vld [vmem:[#allocation10 + $0x78] sm:$0xff] }
 0x280   :  { %v844_v54 = vld [vmem:[#allocation10 + $0x70] sm:$0xff] }
 0x281   :  { %828 = vst [vmem:[#allocation16] sm:$0xff] %v1771_v55  ;;  %v827_v57 = vadd.f32 %v825_v53, %v821_v56  ;;  %v842_v53 = vld [vmem:[#allocation10 + $0x60] sm:$0xff]  ;;  %v835_v56 = vld [vmem:[#allocation10 + $0x28] sm:$0xff] }
 0x283   :  { %829 = vst [vmem:[#allocation16 + $0x8] sm:$0xff] %v827_v57  ;;  %1192 = vmatprep.mubr.f32.mxu1 %v827_v57  ;;  %1263 = vmatprep.mubr.f32.mxu0 %v827_v57 }
 0x284   :  { %1193 = vmatmul.mubr.f32.vlgmr.msra.gmra.mxu1 %v1771_v55  ;;  %1264 = vmatmul.mubr.f32.vlgmr.msra.gmra.mxu0 %v1771_v55 }
 0x285   :  { %1271 = vmatpush1.msra.mxu1 %v954_v58  ;;  %1342 = vmatpush1.msra.mxu0 %v956_v59  ;;  %v834_v58 = vld [vmem:[#allocation10 + $0x20] sm:$0xff]  ;;  %v836_v59 = vld [vmem:[#allocation10 + $0x30] sm:$0xff] }
 0x286   :  { %1272 = vmatprep.subr.mxu1 %v947_v60  ;;  %1334 = vmatprep.mubr.f32.mxu1 %v827_v57  ;;  %v1083_v60 = vld [vmem:[#allocation10 + $0x7e8] sm:$0xff] }
 0x287   :  { %1343 = vmatprep.subr.mxu0 %v949_v61  ;;  %1405 = vmatprep.mubr.f32.mxu0 %v827_v57  ;;  %v837_v57 = vld [vmem:[#allocation10 + $0x38] sm:$0xff] }
 0x288   :  { %1273 = vmatpush1.msra.mxu1 %v946_v62  ;;  %1344 = vmatpush1.msra.mxu0 %v948_v63  ;;  %v1085_v61 = vld [vmem:[#allocation10 + $0x7f8] sm:$0xff]  ;;  %v1082_v62 = vld [vmem:[#allocation10 + $0x7e0] sm:$0xff]  ;;  %v1084_v63 = vld [vmem:[#allocation10 + $0x7f0] sm:$0xff] }
 0x289   :  { %1274 = vmatprep.subr.mxu1 %v939_v0  ;;  %1345 = vmatprep.subr.mxu0 %v941_v1  ;;  %v1075_v0 = vld [vmem:[#allocation10 + $0x7a8] sm:$0xff]  ;;  %v1077_v1 = vld [vmem:[#allocation10 + $0x7b8] sm:$0xff] }
 0x28a   :  { %1275 = vmatpush1.msra.mxu1 %v938_v2  ;;  %1346 = vmatpush1.msra.mxu0 %v940_v5  ;;  %v1074_v2 = vld [vmem:[#allocation10 + $0x7a0] sm:$0xff]  ;;  %v1076_v5 = vld [vmem:[#allocation10 + $0x7b0] sm:$0xff] }
 0x28b   :  { %1276 = vmatprep.subr.mxu1 %v931_v7  ;;  %1347 = vmatprep.subr.mxu0 %v933_v8  ;;  %v1067_v7 = vld [vmem:[#allocation10 + $0x768] sm:$0xff]  ;;  %v1069_v8 = vld [vmem:[#allocation10 + $0x778] sm:$0xff] }
 0x28c   :  { %1277 = vmatpush1.msra.mxu1 %v930_v9  ;;  %1348 = vmatpush1.msra.mxu0 %v932_v10  ;;  %v1066_v9 = vld [vmem:[#allocation10 + $0x760] sm:$0xff]  ;;  %v1068_v10 = vld [vmem:[#allocation10 + $0x770] sm:$0xff] }
 0x28d   :  { %1278 = vmatprep.subr.mxu1 %v923_v11  ;;  %1349 = vmatprep.subr.mxu0 %v925_v12  ;;  %v1059_v11 = vld [vmem:[#allocation10 + $0x728] sm:$0xff]  ;;  %v1061_v12 = vld [vmem:[#allocation10 + $0x738] sm:$0xff] }
 0x28e   :  { %1279 = vmatpush1.msra.mxu1 %v922_v13  ;;  %1350 = vmatpush1.msra.mxu0 %v924_v14  ;;  %v1058_v13 = vld [vmem:[#allocation10 + $0x720] sm:$0xff]  ;;  %v1060_v14 = vld [vmem:[#allocation10 + $0x730] sm:$0xff] }
 0x28f   :  { %1280 = vmatprep.subr.mxu1 %v915_v15  ;;  %1351 = vmatprep.subr.mxu0 %v917_v16  ;;  %v1051_v15 = vld [vmem:[#allocation10 + $0x6e8] sm:$0xff]  ;;  %v1053_v16 = vld [vmem:[#allocation10 + $0x6f8] sm:$0xff] }
 0x290   :  { %1281 = vmatpush1.msra.mxu1 %v914_v17  ;;  %1352 = vmatpush1.msra.mxu0 %v916_v18  ;;  %v1050_v17 = vld [vmem:[#allocation10 + $0x6e0] sm:$0xff]  ;;  %v1052_v18 = vld [vmem:[#allocation10 + $0x6f0] sm:$0xff] }
 0x291   :  { %1282 = vmatprep.subr.mxu1 %v907_v19  ;;  %1353 = vmatprep.subr.mxu0 %v909_v20  ;;  %v1043_v19 = vld [vmem:[#allocation10 + $0x6a8] sm:$0xff]  ;;  %v1045_v20 = vld [vmem:[#allocation10 + $0x6b8] sm:$0xff] }
 0x292   :  { %1283 = vmatpush1.msra.mxu1 %v906_v21  ;;  %1354 = vmatpush1.msra.mxu0 %v908_v22  ;;  %v1042_v21 = vld [vmem:[#allocation10 + $0x6a0] sm:$0xff]  ;;  %v1044_v22 = vld [vmem:[#allocation10 + $0x6b0] sm:$0xff] }
 0x293   :  { %1284 = vmatprep.subr.mxu1 %v899_v23  ;;  %1355 = vmatprep.subr.mxu0 %v901_v24  ;;  %v1035_v23 = vld [vmem:[#allocation10 + $0x668] sm:$0xff]  ;;  %v1037_v24 = vld [vmem:[#allocation10 + $0x678] sm:$0xff] }
 0x294   :  { %1285 = vmatpush1.msra.mxu1 %v898_v25  ;;  %1356 = vmatpush1.msra.mxu0 %v900_v26  ;;  %v1034_v25 = vld [vmem:[#allocation10 + $0x660] sm:$0xff]  ;;  %v1036_v26 = vld [vmem:[#allocation10 + $0x670] sm:$0xff] }
 0x295   :  { %1286 = vmatprep.subr.mxu1 %v891_v27  ;;  %1357 = vmatprep.subr.mxu0 %v893_v28  ;;  %v1027_v27 = vld [vmem:[#allocation10 + $0x628] sm:$0xff]  ;;  %v1029_v28 = vld [vmem:[#allocation10 + $0x638] sm:$0xff] }
 0x296   :  { %1287 = vmatpush1.msra.mxu1 %v890_v29  ;;  %1358 = vmatpush1.msra.mxu0 %v892_v30  ;;  %v1026_v29 = vld [vmem:[#allocation10 + $0x620] sm:$0xff]  ;;  %v1028_v30 = vld [vmem:[#allocation10 + $0x630] sm:$0xff] }
 0x297   :  { %1288 = vmatprep.subr.mxu1 %v883_v31  ;;  %1359 = vmatprep.subr.mxu0 %v885_v32  ;;  %v1019_v31 = vld [vmem:[#allocation10 + $0x5e8] sm:$0xff]  ;;  %v1021_v32 = vld [vmem:[#allocation10 + $0x5f8] sm:$0xff] }
 0x298   :  { %1289 = vmatpush1.msra.mxu1 %v882_v33  ;;  %1360 = vmatpush1.msra.mxu0 %v884_v34  ;;  %v1018_v33 = vld [vmem:[#allocation10 + $0x5e0] sm:$0xff]  ;;  %v1020_v34 = vld [vmem:[#allocation10 + $0x5f0] sm:$0xff] }
 0x299   :  { %1290 = vmatprep.subr.mxu1 %v875_v35  ;;  %1361 = vmatprep.subr.mxu0 %v877_v36  ;;  %v1011_v35 = vld [vmem:[#allocation10 + $0x5a8] sm:$0xff]  ;;  %v1013_v36 = vld [vmem:[#allocation10 + $0x5b8] sm:$0xff] }
 0x29a   :  { %1291 = vmatpush1.msra.mxu1 %v874_v37  ;;  %1362 = vmatpush1.msra.mxu0 %v876_v38  ;;  %v1010_v37 = vld [vmem:[#allocation10 + $0x5a0] sm:$0xff]  ;;  %v1012_v38 = vld [vmem:[#allocation10 + $0x5b0] sm:$0xff] }
 0x29b   :  { %1292 = vmatprep.subr.mxu1 %v867_v39  ;;  %1363 = vmatprep.subr.mxu0 %v869_v40  ;;  %v1003_v39 = vld [vmem:[#allocation10 + $0x568] sm:$0xff]  ;;  %v1005_v40 = vld [vmem:[#allocation10 + $0x578] sm:$0xff] }
 0x29c   :  { %1293 = vmatpush1.msra.mxu1 %v866_v41  ;;  %1364 = vmatpush1.msra.mxu0 %v868_v42  ;;  %v1002_v41 = vld [vmem:[#allocation10 + $0x560] sm:$0xff]  ;;  %v1004_v42 = vld [vmem:[#allocation10 + $0x570] sm:$0xff] }
 0x29d   :  { %1294 = vmatprep.subr.mxu1 %v859_v43  ;;  %1365 = vmatprep.subr.mxu0 %v861_v44  ;;  %v995_v43 = vld [vmem:[#allocation10 + $0x528] sm:$0xff]  ;;  %v997_v44 = vld [vmem:[#allocation10 + $0x538] sm:$0xff] }
 0x29e   :  { %1295 = vmatpush1.msra.mxu1 %v858_v45  ;;  %1366 = vmatpush1.msra.mxu0 %v860_v46  ;;  %v994_v45 = vld [vmem:[#allocation10 + $0x520] sm:$0xff]  ;;  %v996_v46 = vld [vmem:[#allocation10 + $0x530] sm:$0xff] }
 0x29f   :  { %1296 = vmatprep.subr.mxu1 %v851_v47  ;;  %1367 = vmatprep.subr.mxu0 %v853_v48  ;;  %v987_v47 = vld [vmem:[#allocation10 + $0x4e8] sm:$0xff]  ;;  %v989_v48 = vld [vmem:[#allocation10 + $0x4f8] sm:$0xff] }
 0x2a0   :  { %1297 = vmatpush1.msra.mxu1 %v850_v49  ;;  %1368 = vmatpush1.msra.mxu0 %v852_v50  ;;  %v986_v49 = vld [vmem:[#allocation10 + $0x4e0] sm:$0xff]  ;;  %v988_v50 = vld [vmem:[#allocation10 + $0x4f0] sm:$0xff] }
 0x2a1   :  { %1298 = vmatprep.subr.mxu1 %v843_v51  ;;  %1369 = vmatprep.subr.mxu0 %v845_v52  ;;  %v979_v51 = vld [vmem:[#allocation10 + $0x4a8] sm:$0xff]  ;;  %v981_v52 = vld [vmem:[#allocation10 + $0x4b8] sm:$0xff] }
 0x2a2   :  { %1299 = vmatpush1.msra.mxu1 %v842_v53  ;;  %1370 = vmatpush1.msra.mxu0 %v844_v54  ;;  %v978_v53 = vld [vmem:[#allocation10 + $0x4a0] sm:$0xff]  ;;  %v980_v54 = vld [vmem:[#allocation10 + $0x4b0] sm:$0xff] }
 0x2a3   :  { %1300 = vmatprep.subr.mxu1 %v835_v56  ;;  %1371 = vmatprep.subr.mxu0 %v837_v57  ;;  %v971_v56 = vld [vmem:[#allocation10 + $0x468] sm:$0xff]  ;;  %v973_v57 = vld [vmem:[#allocation10 + $0x478] sm:$0xff] }
 0x2a4   :  { %1301 = vmatpush1.msra.mxu1 %v834_v58  ;;  %1372 = vmatpush1.msra.mxu0 %v836_v59  ;;  %v970_v58 = vld [vmem:[#allocation10 + $0x460] sm:$0xff]  ;;  %v972_v59 = vld [vmem:[#allocation10 + $0x470] sm:$0xff] }
 0x2a5   :  { %1302 = vmatprep.subr.mxu1 %v1083_v60  ;;  %1373 = vmatprep.subr.mxu0 %v1085_v61  ;;  %v963_v60 = vld [vmem:[#allocation10 + $0x428] sm:$0xff]  ;;  %v965_v61 = vld [vmem:[#allocation10 + $0x438] sm:$0xff] }
 0x2a6   :  { %1303 = vmatpush2.msra.mxu1 %v1082_v62  ;;  %1374 = vmatpush2.msra.mxu0 %v1084_v63  ;;  %v962_v62 = vld [vmem:[#allocation10 + $0x420] sm:$0xff]  ;;  %v964_v63 = vld [vmem:[#allocation10 + $0x430] sm:$0xff] }
 0x2a7   :  { %1304 = vmatprep.subr.mxu1 %v1075_v0  ;;  %1375 = vmatprep.subr.mxu0 %v1077_v1 }
 0x2a8   :  { %1305 = vmatpush2.msra.mxu1 %v1074_v2  ;;  %1376 = vmatpush2.msra.mxu0 %v1076_v5 }
 0x2a9   :  { %1306 = vmatprep.subr.mxu1 %v1067_v7  ;;  %1377 = vmatprep.subr.mxu0 %v1069_v8 }
 0x2aa   :  { %1307 = vmatpush2.msra.mxu1 %v1066_v9  ;;  %1378 = vmatpush2.msra.mxu0 %v1068_v10 }
 0x2ab   :  { %1308 = vmatprep.subr.mxu1 %v1059_v11  ;;  %1379 = vmatprep.subr.mxu0 %v1061_v12 }
 0x2ac   :  { %1309 = vmatpush2.msra.mxu1 %v1058_v13  ;;  %1380 = vmatpush2.msra.mxu0 %v1060_v14 }
 0x2ad   :  { %1310 = vmatprep.subr.mxu1 %v1051_v15  ;;  %1381 = vmatprep.subr.mxu0 %v1053_v16 }
 0x2ae   :  { %1311 = vmatpush2.msra.mxu1 %v1050_v17  ;;  %1382 = vmatpush2.msra.mxu0 %v1052_v18 }
 0x2af   :  { %1312 = vmatprep.subr.mxu1 %v1043_v19  ;;  %1383 = vmatprep.subr.mxu0 %v1045_v20 }
 0x2b0   :  { %1313 = vmatpush2.msra.mxu1 %v1042_v21  ;;  %1384 = vmatpush2.msra.mxu0 %v1044_v22 }
 0x2b1   :  { %1314 = vmatprep.subr.mxu1 %v1035_v23  ;;  %1385 = vmatprep.subr.mxu0 %v1037_v24 }
 0x2b2   :  { %1315 = vmatpush2.msra.mxu1 %v1034_v25  ;;  %1386 = vmatpush2.msra.mxu0 %v1036_v26 }
 0x2b3   :  { %1316 = vmatprep.subr.mxu1 %v1027_v27  ;;  %1387 = vmatprep.subr.mxu0 %v1029_v28 }
 0x2b4   :  { %1317 = vmatpush2.msra.mxu1 %v1026_v29  ;;  %1388 = vmatpush2.msra.mxu0 %v1028_v30 }
 0x2b5   :  { %1318 = vmatprep.subr.mxu1 %v1019_v31  ;;  %1389 = vmatprep.subr.mxu0 %v1021_v32 }
 0x2b6   :  { %1319 = vmatpush2.msra.mxu1 %v1018_v33  ;;  %1390 = vmatpush2.msra.mxu0 %v1020_v34 }
 0x2b7   :  { %1320 = vmatprep.subr.mxu1 %v1011_v35  ;;  %1391 = vmatprep.subr.mxu0 %v1013_v36 }
 0x2b8   :  { %1321 = vmatpush2.msra.mxu1 %v1010_v37  ;;  %1392 = vmatpush2.msra.mxu0 %v1012_v38 }
 0x2b9   :  { %1322 = vmatprep.subr.mxu1 %v1003_v39  ;;  %1393 = vmatprep.subr.mxu0 %v1005_v40 }
 0x2ba   :  { %1323 = vmatpush2.msra.mxu1 %v1002_v41  ;;  %1394 = vmatpush2.msra.mxu0 %v1004_v42 }
 0x2bb   :  { %1324 = vmatprep.subr.mxu1 %v995_v43  ;;  %1395 = vmatprep.subr.mxu0 %v997_v44 }
 0x2bc   :  { %1325 = vmatpush2.msra.mxu1 %v994_v45  ;;  %1396 = vmatpush2.msra.mxu0 %v996_v46 }
 0x2bd   :  { %1326 = vmatprep.subr.mxu1 %v987_v47  ;;  %1397 = vmatprep.subr.mxu0 %v989_v48 }
 0x2be   :  { %1327 = vmatpush2.msra.mxu1 %v986_v49  ;;  %1398 = vmatpush2.msra.mxu0 %v988_v50 }
 0x2bf   :  { %1328 = vmatprep.subr.mxu1 %v979_v51  ;;  %1399 = vmatprep.subr.mxu0 %v981_v52 }
 0x2c0   :  { %1329 = vmatpush2.msra.mxu1 %v978_v53  ;;  %1400 = vmatpush2.msra.mxu0 %v980_v54 }
 0x2c1   :  { %1330 = vmatprep.subr.mxu1 %v971_v56  ;;  %1401 = vmatprep.subr.mxu0 %v973_v57 }
 0x2c2   :  { %1331 = vmatpush2.msra.mxu1 %v970_v58  ;;  %1402 = vmatpush2.msra.mxu0 %v972_v59 }
 0x2c3   :  { %1332 = vmatprep.subr.mxu1 %v963_v60  ;;  %1403 = vmatprep.subr.mxu0 %v965_v61 }
 0x2c4   :  { %1333 = vmatpush2.msra.mxu1 %v962_v62  ;;  %1404 = vmatpush2.msra.mxu0 %v964_v63 }
 0x2c5   :  { %1335 = vmatmul.mubr.f32.vlgmr.msra.gmra.mxu1 %v1771_v55  ;;  %1406 = vmatmul.mubr.f32.vlgmr.msra.gmra.mxu0 %v1771_v55 }
 0x2c6   :  { %1621 = shalt.err (!%p1618_p6)
}
 0x2c7   :  { %1439 = dma.vmem_to_hbm [thread:$0]  %s1437_s6, 256, %s1808_s8, [#allocation15]  }
 0x2c8   :  { %s1693_s21 = smov [#allocation16]  }
 0x2c9   :  { %s1446_s22 = sshll.u32 %s1693_s21, 4  ;;  %s1447_s22 = int_to_ptr.vmem [resolvable:$true] %s1446_s22 }
 0x2ca   :  { %s1630_s23 = scalar_lea.vmem %s1447_s22, 256  ;;  %p1635_p8 = scmp.lt.s32.totalorder %s1447_s22, %s1447_s22 }
 0x2cb   :  { %p1631_p7 = scmp.ne.s32.totalorder %s1447_s22, %s1630_s23  ;;  %p1636_p9 = scmp.lt.s32.totalorder %s1630_s23, %s1630_s23 }
 0x2cd   :  { %p1637_p10 = por %p1636_p9, %p1635_p8 }
 0x2cf   :  { %p1638_p11 = pnand %p1637_p10, %p1631_p7 }
 0x2d1   :  { %1641 = shalt.err (!%p1638_p11)
}
 0x2d2   :  { %1449 = dma.vmem_to_hbm [thread:$0]  %s1447_s22, 256, %s1809_s9, [#allocation15]   ;;  %v1098_v55 = vsub.s32 2, %v1763_v3  ;;  %v1086_v0 = vld [vmem:[%s1805_s5] sm:$0xff]  ;;  %v1102_v1 = vsub.s32 3, %v1763_v3  ;;  %v1106_v17 = vsub.s32 4, %v1763_v3 }
 0x2d3   :  { %v1091_v2 = vrot.slane %v1086_v0, %v375_v4  ;;  %v1095_v7 = vrot.slane %v1086_v0, %v379_v6  ;;  %v1114_v4 = vsub.s32 6, %v1763_v3  ;;  %v1110_v18 = vsub.s32 5, %v1763_v3  ;;  %s1694_s5 = smov [#allocation13]  }
 0x2d4   :  { %v1099_v5 = vrot.slane %v1086_v0, %v1098_v55  ;;  %v1103_v8 = vrot.slane %v1086_v0, %v1102_v1  ;;  %v1118_v6 = vsub.s32 7, %v1763_v3  ;;  %v1107_v19 = vrot.slane %v1086_v0, %v1106_v17  ;;  %s1426_s8 = sshll.u32 %s1694_s5, 4  ;;  %s1427_s8 = int_to_ptr.vmem [resolvable:$true] %s1426_s8 }
 0x2d5   :  { %v1115_v20 = vrot.slane %v1086_v0, %v1114_v4  ;;  %v1111_v21 = vrot.slane %v1086_v0, %v1110_v18  ;;  %s1650_s9 = scalar_lea.vmem %s1427_s8, 1024  ;;  %p1655_p13 = scmp.lt.s32.totalorder %s1427_s8, %s1427_s8 }
 0x2d6   :  { %v1119_v22 = vrot.slane %v1086_v0, %v1118_v6  ;;  %p1651_p12 = scmp.ne.s32.totalorder %s1427_s8, %s1650_s9  ;;  %p1656_p0 = scmp.lt.s32.totalorder %s1650_s9, %s1650_s9 }
 0x2d8   :  { %p1657_p1 = por %p1656_p0, %p1655_p13 }
 0x2da   :  { %p1658_p2 = pnand %p1657_p1, %p1651_p12 }
 0x344   :  { %v1194_v9 = vpop.f32.mrf.mxu1  ;;  %v1265_v10 = vpop.f32.mrf.mxu0 }
 0x345   :  { %v1195_v11 = vadd.f32 %v1194_v9, %v1091_v2  ;;  %v1266_v12 = vadd.f32 %v1265_v10, %v1099_v5 }
 0x346   :  { %v1196_v13 = vpop.f32.mrf.mxu1  ;;  %v1267_v14 = vpop.f32.mrf.mxu0 }
 0x347   :  { %1412 = vst [vmem:[#allocation13] sm:$0xff] %v1195_v11  ;;  %1414 = vst [vmem:[#allocation13 + $0x10] sm:$0xff] %v1266_v12  ;;  %v1197_v15 = vadd.f32 %v1196_v13, %v1095_v7  ;;  %v1268_v16 = vadd.f32 %v1267_v14, %v1103_v8 }
 0x349   :  { %1413 = vst [vmem:[#allocation13 + $0x8] sm:$0xff] %v1197_v15  ;;  %1415 = vst [vmem:[#allocation13 + $0x18] sm:$0xff] %v1268_v16 }
 0x385   :  { %v1336_v23 = vpop.f32.mrf.mxu1  ;;  %v1407_v24 = vpop.f32.mrf.mxu0 }
 0x386   :  { %v1337_v25 = vadd.f32 %v1336_v23, %v1107_v19  ;;  %v1408_v26 = vadd.f32 %v1407_v24, %v1115_v20 }
 0x387   :  { %v1338_v27 = vpop.f32.mrf.mxu1  ;;  %v1409_v28 = vpop.f32.mrf.mxu0 }
 0x388   :  { %1416 = vst [vmem:[#allocation13 + $0x20] sm:$0xff] %v1337_v25  ;;  %1418 = vst [vmem:[#allocation13 + $0x30] sm:$0xff] %v1408_v26  ;;  %v1339_v29 = vadd.f32 %v1338_v27, %v1111_v21  ;;  %v1410_v30 = vadd.f32 %v1409_v28, %v1119_v22 }
 0x38a   :  { %1417 = vst [vmem:[#allocation13 + $0x28] sm:$0xff] %v1339_v29  ;;  %1419 = vst [vmem:[#allocation13 + $0x38] sm:$0xff] %v1410_v30 }
 0x38b   :  { %1661 = shalt.err (!%p1658_p2)
}
 0x38c   :  { %1429 = dma.vmem_to_hbm [thread:$0]  %s1427_s8, 1024, %s1807_s7, [#allocation4]  }
 0x38d   :  { %1678 = dma.done.wait [#allocation4], 1024  }
 0x38e   :  { %1679 = vsyncadd [#allocation4], 4294966272 }
 0x38f   :  { %1680 = dma.done.wait [#allocation15], 512  }
 0x390   :  { %1681 = vsyncadd [#allocation15], 4294966784 }
 0x391   :  { %1459 = vsyncpa [#allocation3], 1 }
 0x392   :  { %1460 = vsyncpa [#allocation6], 1 }
 0x393   :  { %1461 = vsyncpa [#allocation9], 1 }
 0x394   :  { %1462 = vsyncpa [#allocation12], 1 }
 0x395   :  { %1463 = vsyncpa [#allocation4], 1 }
 0x396   :  { %1464 = vsyncpa [#allocation15], 1 }

</bundles_post_ra>
